<compile_context>
chip_gen: v6e
topology: v6e:2x2x1
jax: 0.10.0
libtpu: 0.0.40
codegen_flags: <defaults>
</compile_context>

<pallas_src>
import functools
import math

import jax
import jax.numpy as jnp
from jax import lax
from jax.experimental import pallas as pl
from jax.experimental.pallas import tpu as pltpu


def _mha_kernel(x_ref, wqkv_ref, wp_ref, b_ref, o_ref, qkv_ref, cat_ref,
                *, num_heads, head_size):
    E = num_heads * head_size
    x = x_ref[0]                                  # (T, E) one batch row
    T = x.shape[0]

    # Fused QKV projection (scale pre-folded into the Q columns of wqkv).
    # Stream the (T, 3E) result to VMEM scratch so per-head slices are VMEM
    # loads rather than a huge live vreg footprint.
    qkv_ref[...] = jnp.dot(x, wqkv_ref[...],
                           preferred_element_type=jnp.float32)

    # Causal mask for the full sequence (diagonal always unmasked -> -inf is
    # safe; every softmax row has at least one finite entry).
    row_ids = lax.broadcasted_iota(jnp.int32, (T, T), 0)
    col_ids = lax.broadcasted_iota(jnp.int32, (T, T), 1)
    causal = col_ids <= row_ids

    for h in range(num_heads):                    # static unroll over heads
        lo = h * head_size
        hi = (h + 1) * head_size
        qh = qkv_ref[:, lo:hi]                    # (T, H)
        kh = qkv_ref[:, E + lo:E + hi]            # (T, H)
        vh = qkv_ref[:, 2 * E + lo:2 * E + hi]    # (T, H)

        # QK^T without materializing a transpose: contract dim 1 with dim 1.
        s = lax.dot_general(qh, kh, (((1,), (1,)), ((), ())),
                            preferred_element_type=jnp.float32)  # (T, T)
        s = jnp.where(causal, s, -jnp.inf)

        # Numerically stable softmax with deferred normalization: normalize
        # the (T, H) PV product instead of the (T, T) probabilities.
        m = jnp.max(s, axis=-1, keepdims=True)
        e = jnp.exp(s - m)
        d = jnp.sum(e, axis=-1, keepdims=True)    # >= 1 -> approx rcp is safe
        oh = jnp.dot(e, vh, preferred_element_type=jnp.float32)  # (T, H)

        # "Concatenate" by writing the head's columns into VMEM scratch.
        cat_ref[:, lo:hi] = oh * pl.reciprocal(d, approx=True)

    # Output projection (weight pre-transposed to (E, E)) + bias.
    out = jnp.dot(cat_ref[...], wp_ref[...], preferred_element_type=jnp.float32)
    o_ref[0] = (out + b_ref[...]).astype(o_ref.dtype)


def multi_head_attention(x, wq_heads, wk_heads, wv_heads, w_proj, b_proj):
    """x: (B, T, E); w{q,k,v}_heads: (nH, H, E) PyTorch-style (out, in) per
    head; w_proj: (E, nH*H) PyTorch-style; b_proj: (E,). Returns (B, T, E)."""
    B, T, E = x.shape
    nH, H, _ = wq_heads.shape
    assert nH * H == E, "num_heads * head_size must equal n_embd"
    assert w_proj.shape == (E, nH * H)
    # Fully sequence-resident design: fine for the module's block_size (256).
    assert T <= 1024, "use a streamed-KV (flash) variant for long sequences"

    scale = float(E) ** -0.5   # PyTorch module: C ** (-0.5) with C = n_embd

    # Layout plumbing in the wrapper (no numeric change beyond folding the
    # softmax scale into Wq): fuse heads, pre-transpose to (in, out), and pack
    # Q|K|V along the lane axis into one (E, 3E) weight.
    def fuse(w):  # (nH, H, E) -> (E, nH*H)
        return jnp.transpose(w, (2, 0, 1)).reshape(E, nH * H)

    w_qkv = jnp.concatenate(
        [fuse(wq_heads) * scale, fuse(wk_heads), fuse(wv_heads)], axis=1)
    wp_t = jnp.transpose(w_proj)        # (nH*H, E) == (E, E)
    bias = b_proj.reshape(1, E)

    kernel = functools.partial(_mha_kernel, num_heads=nH, head_size=H)

    return pl.pallas_call(
        kernel,
        out_shape=jax.ShapeDtypeStruct((B, T, E), x.dtype),
        grid_spec=pltpu.PrefetchScalarGridSpec(
            num_scalar_prefetch=0,
            grid=(B,),
            in_specs=[
                pl.BlockSpec((1, T, E), lambda b: (b, 0, 0)),      # x
                pl.BlockSpec((E, 3 * E), lambda b: (0, 0)),        # packed Wqkv
                pl.BlockSpec((E, E), lambda b: (0, 0)),            # Wproj^T
                pl.BlockSpec((1, E), lambda b: (0, 0)),            # bias
            ],
            out_specs=pl.BlockSpec((1, T, E), lambda b: (b, 0, 0)),
            scratch_shapes=[
                pltpu.VMEM((T, 3 * E), jnp.float32),   # QKV projections
                pltpu.VMEM((T, E), jnp.float32),       # concatenated heads
            ],
        ),
        compiler_params=pltpu.CompilerParams(
            dimension_semantics=("parallel",)),
    )(x, w_qkv, wp_t, bias)


def multi_head_attention_ref(x, wq_heads, wk_heads, wv_heads, w_proj, b_proj):
    """Pure-JAX reference mirroring the PyTorch MultiHeadAttention forward."""
    B, T, E = x.shape
    nH = wq_heads.shape[0]
    scale = float(E) ** -0.5
    tril = jnp.tril(jnp.ones((T, T), dtype=bool))
    outs = []
    for h in range(nH):
        q = x @ wq_heads[h].T
        k = x @ wk_heads[h].T
        v = x @ wv_heads[h].T
        wei = jnp.einsum("btd,bsd->bts", q, k) * scale
        wei = jnp.where(tril, wei, -jnp.inf)
        wei = jax.nn.softmax(wei, axis=-1)
        outs.append(jnp.einsum("bts,bsd->btd", wei, v))
    cat = jnp.concatenate(outs, axis=-1)
    return cat @ w_proj.T + b_proj


if __name__ == "__main__":
    # Small shapes consistent with the module (n_embd = 128, T <= block_size).
    B, T = 2, 64
    n_embd = 128
    num_heads, head_size = 4, 32

    key = jax.random.PRNGKey(0)
    kx, kq, kk, kv, kp, kb = jax.random.split(key, 6)

    x = jax.random.normal(kx, (B, T, n_embd), dtype=jnp.float32)

    # PyTorch-style parameter shapes: per-head Linear weights (out=H, in=E).
    bound = 1.0 / math.sqrt(n_embd)
    wq_heads = jax.random.uniform(kq, (num_heads, head_size, n_embd),
                                  jnp.float32, -bound, bound)
    wk_heads = jax.random.uniform(kk, (num_heads, head_size, n_embd),
                                  jnp.float32, -bound, bound)
    wv_heads = jax.random.uniform(kv, (num_heads, head_size, n_embd),
                                  jnp.float32, -bound, bound)
    w_proj = jax.random.uniform(kp, (n_embd, num_heads * head_size),
                                jnp.float32, -bound, bound)
    b_proj = jax.random.uniform(kb, (n_embd,), jnp.float32, -bound, bound)

    out = multi_head_attention(x, wq_heads, wk_heads, wv_heads, w_proj, b_proj)
    out = jax.block_until_ready(out)

    ref = multi_head_attention_ref(x, wq_heads, wk_heads, wv_heads,
                                   w_proj, b_proj)
    assert out.shape == (B, T, n_embd)
    # Tolerance relaxed slightly vs. pure-f32 (3e-3) because the kernel uses
    # the EUP approximate reciprocal for the softmax denominator.
    err = float(jnp.max(jnp.abs(out - ref)))
    assert jnp.allclose(out, ref, atol=3e-3, rtol=3e-3), err

    print("KERNEL_OK")
</pallas_src>

<mosaic_0001>
module attributes {stable_mosaic.version = 11 : i64} {
  func.func @_mha_kernel(%arg0: i32, %arg1: memref<1x64x128xf32, #tpu.memory_space<vmem>>, %arg2: memref<128x384xf32, #tpu.memory_space<vmem>>, %arg3: memref<128x128xf32, #tpu.memory_space<vmem>>, %arg4: memref<1x128xf32, #tpu.memory_space<vmem>>, %arg5: memref<1x64x128xf32, #tpu.memory_space<vmem>>, %arg6: memref<64x384xf32, #tpu.memory_space<vmem>>, %arg7: memref<64x128xf32, #tpu.memory_space<vmem>>) attributes {dimension_semantics = [#tpu.dimension_semantics<parallel>], iteration_bounds = array<i64: 2>, scalar_prefetch = 0 : i64, scratch_operands = 2 : i64, tpu.core_type = #tpu.core_type<tc>, window_params = [{transform_indices = @transform_0, window_bounds = array<i64: 1, 64, 128>}, {pipeline_mode = #tpu.pipeline_mode<synchronous>, transform_indices = @transform_1, window_bounds = array<i64: 128, 384>}, {pipeline_mode = #tpu.pipeline_mode<synchronous>, transform_indices = @transform_2, window_bounds = array<i64: 128, 128>}, {pipeline_mode = #tpu.pipeline_mode<synchronous>, transform_indices = @transform_3, window_bounds = array<i64: 1, 128>}, {transform_indices = @transform_4, window_bounds = array<i64: 1, 64, 128>}]} {
    %c0 = arith.constant 0 : index
    %c0_0 = arith.constant 0 : index
    %c0_1 = arith.constant 0 : index
    %0 = vector.load %arg1[%c0, %c0_0, %c0_1] : memref<1x64x128xf32, #tpu.memory_space<vmem>>, vector<1x64x128xf32>
    %1 = vector.shape_cast %0 : vector<1x64x128xf32> to vector<64x128xf32>
    %c0_2 = arith.constant 0 : index
    %c0_3 = arith.constant 0 : index
    %2 = vector.load %arg2[%c0_2, %c0_3] : memref<128x384xf32, #tpu.memory_space<vmem>>, vector<128x384xf32>
    %cst = arith.constant dense<0.000000e+00> : vector<64x384xf32>
    %3 = tpu.matmul %1, %2, %cst {dimension_numbers = #tpu.dot_dimension_numbers<[1], [0], [0], [1], [0, 0, 1, 1], [], []>} : vector<64x128xf32>, vector<128x384xf32>, vector<64x384xf32> -> vector<64x384xf32>
    %c0_4 = arith.constant 0 : index
    %c0_5 = arith.constant 0 : index
    %4 = vector.load %arg6[%c0_4, %c0_5] : memref<64x384xf32, #tpu.memory_space<vmem>>, vector<64x384xf32>
    tpu.vector_store %arg6[%c0_4, %c0_5], %3 {strides = array<i32>} : memref<64x384xf32, #tpu.memory_space<vmem>>, vector<64x384xf32>,
    %5 = tpu.iota {dimensions = array<i32: 0>} : vector<64x64xi32>
    %6 = tpu.iota {dimensions = array<i32: 1>} : vector<64x64xi32>
    %7 = arith.cmpi sle, %6, %5 : vector<64x64xi32>
    %c0_6 = arith.constant 0 : index
    %c0_7 = arith.constant 0 : index
    %8 = vector.load %arg6[%c0_6, %c0_7] : memref<64x384xf32, #tpu.memory_space<vmem>>, vector<64x32xf32>
    %c0_8 = arith.constant 0 : index
    %c128 = arith.constant 128 : index
    %9 = vector.load %arg6[%c0_8, %c128] : memref<64x384xf32, #tpu.memory_space<vmem>>, vector<64x32xf32>
    %c0_9 = arith.constant 0 : index
    %c256 = arith.constant 256 : index
    %10 = vector.load %arg6[%c0_9, %c256] : memref<64x384xf32, #tpu.memory_space<vmem>>, vector<64x32xf32>
    %cst_10 = arith.constant dense<0.000000e+00> : vector<64x64xf32>
    %11 = tpu.matmul %8, %9, %cst_10 {dimension_numbers = #tpu.dot_dimension_numbers<[1], [1], [0], [0], [0, 0, 1, 0], [], []>} : vector<64x32xf32>, vector<64x32xf32>, vector<64x64xf32> -> vector<64x64xf32>
    %cst_11 = arith.constant 0xFF800000 : f32
    %12 = vector.broadcast %cst_11 : f32 to vector<64x64xf32>
    %13 = arith.select %7, %11, %12 : vector<64x64xi1>, vector<64x64xf32>
    %cst_12 = arith.constant dense<0xFF800000> : vector<64xf32>
    %14 = vector.multi_reduction <maximumf>, %13, %cst_12 [1] : vector<64x64xf32> to vector<64xf32>
    %15 = vector.shape_cast %14 : vector<64xf32> to vector<64x1xf32>
    %16 = vector.broadcast %15 : vector<64x1xf32> to vector<64x64xf32>
    %17 = arith.subf %13, %16 : vector<64x64xf32>
    %18 = math.exp %17 : vector<64x64xf32>
    %cst_13 = arith.constant dense<0.000000e+00> : vector<64xf32>
    %19 = vector.multi_reduction <add>, %18, %cst_13 [1] : vector<64x64xf32> to vector<64xf32>
    %20 = vector.shape_cast %19 : vector<64xf32> to vector<64x1xf32>
    %cst_14 = arith.constant dense<0.000000e+00> : vector<64x32xf32>
    %21 = tpu.matmul %18, %10, %cst_14 {dimension_numbers = #tpu.dot_dimension_numbers<[1], [0], [0], [1], [0, 0, 1, 1], [], []>} : vector<64x64xf32>, vector<64x32xf32>, vector<64x32xf32> -> vector<64x32xf32>
    %22 = tpu.reciprocal %20 {approx = true} : vector<64x1xf32> -> vector<64x1xf32>
    %23 = vector.broadcast %22 : vector<64x1xf32> to vector<64x32xf32>
    %24 = arith.mulf %21, %23 : vector<64x32xf32>
    %c0_15 = arith.constant 0 : index
    %c0_16 = arith.constant 0 : index
    %25 = vector.load %arg7[%c0_15, %c0_16] : memref<64x128xf32, #tpu.memory_space<vmem>>, vector<64x32xf32>
    tpu.vector_store %arg7[%c0_15, %c0_16], %24 {strides = array<i32>} : memref<64x128xf32, #tpu.memory_space<vmem>>, vector<64x32xf32>,
    %c0_17 = arith.constant 0 : index
    %c32 = arith.constant 32 : index
    %26 = vector.load %arg6[%c0_17, %c32] : memref<64x384xf32, #tpu.memory_space<vmem>>, vector<64x32xf32>
    %c0_18 = arith.constant 0 : index
    %c160 = arith.constant 160 : index
    %27 = vector.load %arg6[%c0_18, %c160] : memref<64x384xf32, #tpu.memory_space<vmem>>, vector<64x32xf32>
    %c0_19 = arith.constant 0 : index
    %c288 = arith.constant 288 : index
    %28 = vector.load %arg6[%c0_19, %c288] : memref<64x384xf32, #tpu.memory_space<vmem>>, vector<64x32xf32>
    %cst_20 = arith.constant dense<0.000000e+00> : vector<64x64xf32>
    %29 = tpu.matmul %26, %27, %cst_20 {dimension_numbers = #tpu.dot_dimension_numbers<[1], [1], [0], [0], [0, 0, 1, 0], [], []>} : vector<64x32xf32>, vector<64x32xf32>, vector<64x64xf32> -> vector<64x64xf32>
    %cst_21 = arith.constant 0xFF800000 : f32
    %30 = vector.broadcast %cst_21 : f32 to vector<64x64xf32>
    %31 = arith.select %7, %29, %30 : vector<64x64xi1>, vector<64x64xf32>
    %cst_22 = arith.constant dense<0xFF800000> : vector<64xf32>
    %32 = vector.multi_reduction <maximumf>, %31, %cst_22 [1] : vector<64x64xf32> to vector<64xf32>
    %33 = vector.shape_cast %32 : vector<64xf32> to vector<64x1xf32>
    %34 = vector.broadcast %33 : vector<64x1xf32> to vector<64x64xf32>
    %35 = arith.subf %31, %34 : vector<64x64xf32>
    %36 = math.exp %35 : vector<64x64xf32>
    %cst_23 = arith.constant dense<0.000000e+00> : vector<64xf32>
    %37 = vector.multi_reduction <add>, %36, %cst_23 [1] : vector<64x64xf32> to vector<64xf32>
    %38 = vector.shape_cast %37 : vector<64xf32> to vector<64x1xf32>
    %cst_24 = arith.constant dense<0.000000e+00> : vector<64x32xf32>
    %39 = tpu.matmul %36, %28, %cst_24 {dimension_numbers = #tpu.dot_dimension_numbers<[1], [0], [0], [1], [0, 0, 1, 1], [], []>} : vector<64x64xf32>, vector<64x32xf32>, vector<64x32xf32> -> vector<64x32xf32>
    %40 = tpu.reciprocal %38 {approx = true} : vector<64x1xf32> -> vector<64x1xf32>
    %41 = vector.broadcast %40 : vector<64x1xf32> to vector<64x32xf32>
    %42 = arith.mulf %39, %41 : vector<64x32xf32>
    %c0_25 = arith.constant 0 : index
    %c32_26 = arith.constant 32 : index
    %43 = vector.load %arg7[%c0_25, %c32_26] : memref<64x128xf32, #tpu.memory_space<vmem>>, vector<64x32xf32>
    tpu.vector_store %arg7[%c0_25, %c32_26], %42 {strides = array<i32>} : memref<64x128xf32, #tpu.memory_space<vmem>>, vector<64x32xf32>,
    %c0_27 = arith.constant 0 : index
    %c64 = arith.constant 64 : index
    %44 = vector.load %arg6[%c0_27, %c64] : memref<64x384xf32, #tpu.memory_space<vmem>>, vector<64x32xf32>
    %c0_28 = arith.constant 0 : index
    %c192 = arith.constant 192 : index
    %45 = vector.load %arg6[%c0_28, %c192] : memref<64x384xf32, #tpu.memory_space<vmem>>, vector<64x32xf32>
    %c0_29 = arith.constant 0 : index
    %c320 = arith.constant 320 : index
    %46 = vector.load %arg6[%c0_29, %c320] : memref<64x384xf32, #tpu.memory_space<vmem>>, vector<64x32xf32>
    %cst_30 = arith.constant dense<0.000000e+00> : vector<64x64xf32>
    %47 = tpu.matmul %44, %45, %cst_30 {dimension_numbers = #tpu.dot_dimension_numbers<[1], [1], [0], [0], [0, 0, 1, 0], [], []>} : vector<64x32xf32>, vector<64x32xf32>, vector<64x64xf32> -> vector<64x64xf32>
    %cst_31 = arith.constant 0xFF800000 : f32
    %48 = vector.broadcast %cst_31 : f32 to vector<64x64xf32>
    %49 = arith.select %7, %47, %48 : vector<64x64xi1>, vector<64x64xf32>
    %cst_32 = arith.constant dense<0xFF800000> : vector<64xf32>
    %50 = vector.multi_reduction <maximumf>, %49, %cst_32 [1] : vector<64x64xf32> to vector<64xf32>
    %51 = vector.shape_cast %50 : vector<64xf32> to vector<64x1xf32>
    %52 = vector.broadcast %51 : vector<64x1xf32> to vector<64x64xf32>
    %53 = arith.subf %49, %52 : vector<64x64xf32>
    %54 = math.exp %53 : vector<64x64xf32>
    %cst_33 = arith.constant dense<0.000000e+00> : vector<64xf32>
    %55 = vector.multi_reduction <add>, %54, %cst_33 [1] : vector<64x64xf32> to vector<64xf32>
    %56 = vector.shape_cast %55 : vector<64xf32> to vector<64x1xf32>
    %cst_34 = arith.constant dense<0.000000e+00> : vector<64x32xf32>
    %57 = tpu.matmul %54, %46, %cst_34 {dimension_numbers = #tpu.dot_dimension_numbers<[1], [0], [0], [1], [0, 0, 1, 1], [], []>} : vector<64x64xf32>, vector<64x32xf32>, vector<64x32xf32> -> vector<64x32xf32>
    %58 = tpu.reciprocal %56 {approx = true} : vector<64x1xf32> -> vector<64x1xf32>
    %59 = vector.broadcast %58 : vector<64x1xf32> to vector<64x32xf32>
    %60 = arith.mulf %57, %59 : vector<64x32xf32>
    %c0_35 = arith.constant 0 : index
    %c64_36 = arith.constant 64 : index
    %61 = vector.load %arg7[%c0_35, %c64_36] : memref<64x128xf32, #tpu.memory_space<vmem>>, vector<64x32xf32>
    tpu.vector_store %arg7[%c0_35, %c64_36], %60 {strides = array<i32>} : memref<64x128xf32, #tpu.memory_space<vmem>>, vector<64x32xf32>,
    %c0_37 = arith.constant 0 : index
    %c96 = arith.constant 96 : index
    %62 = vector.load %arg6[%c0_37, %c96] : memref<64x384xf32, #tpu.memory_space<vmem>>, vector<64x32xf32>
    %c0_38 = arith.constant 0 : index
    %c224 = arith.constant 224 : index
    %63 = vector.load %arg6[%c0_38, %c224] : memref<64x384xf32, #tpu.memory_space<vmem>>, vector<64x32xf32>
    %c0_39 = arith.constant 0 : index
    %c352 = arith.constant 352 : index
    %64 = vector.load %arg6[%c0_39, %c352] : memref<64x384xf32, #tpu.memory_space<vmem>>, vector<64x32xf32>
    %cst_40 = arith.constant dense<0.000000e+00> : vector<64x64xf32>
    %65 = tpu.matmul %62, %63, %cst_40 {dimension_numbers = #tpu.dot_dimension_numbers<[1], [1], [0], [0], [0, 0, 1, 0], [], []>} : vector<64x32xf32>, vector<64x32xf32>, vector<64x64xf32> -> vector<64x64xf32>
    %cst_41 = arith.constant 0xFF800000 : f32
    %66 = vector.broadcast %cst_41 : f32 to vector<64x64xf32>
    %67 = arith.select %7, %65, %66 : vector<64x64xi1>, vector<64x64xf32>
    %cst_42 = arith.constant dense<0xFF800000> : vector<64xf32>
    %68 = vector.multi_reduction <maximumf>, %67, %cst_42 [1] : vector<64x64xf32> to vector<64xf32>
    %69 = vector.shape_cast %68 : vector<64xf32> to vector<64x1xf32>
    %70 = vector.broadcast %69 : vector<64x1xf32> to vector<64x64xf32>
    %71 = arith.subf %67, %70 : vector<64x64xf32>
    %72 = math.exp %71 : vector<64x64xf32>
    %cst_43 = arith.constant dense<0.000000e+00> : vector<64xf32>
    %73 = vector.multi_reduction <add>, %72, %cst_43 [1] : vector<64x64xf32> to vector<64xf32>
    %74 = vector.shape_cast %73 : vector<64xf32> to vector<64x1xf32>
    %cst_44 = arith.constant dense<0.000000e+00> : vector<64x32xf32>
    %75 = tpu.matmul %72, %64, %cst_44 {dimension_numbers = #tpu.dot_dimension_numbers<[1], [0], [0], [1], [0, 0, 1, 1], [], []>} : vector<64x64xf32>, vector<64x32xf32>, vector<64x32xf32> -> vector<64x32xf32>
    %76 = tpu.reciprocal %74 {approx = true} : vector<64x1xf32> -> vector<64x1xf32>
    %77 = vector.broadcast %76 : vector<64x1xf32> to vector<64x32xf32>
    %78 = arith.mulf %75, %77 : vector<64x32xf32>
    %c0_45 = arith.constant 0 : index
    %c96_46 = arith.constant 96 : index
    %79 = vector.load %arg7[%c0_45, %c96_46] : memref<64x128xf32, #tpu.memory_space<vmem>>, vector<64x32xf32>
    tpu.vector_store %arg7[%c0_45, %c96_46], %78 {strides = array<i32>} : memref<64x128xf32, #tpu.memory_space<vmem>>, vector<64x32xf32>,
    %c0_47 = arith.constant 0 : index
    %c0_48 = arith.constant 0 : index
    %80 = vector.load %arg7[%c0_47, %c0_48] : memref<64x128xf32, #tpu.memory_space<vmem>>, vector<64x128xf32>
    %c0_49 = arith.constant 0 : index
    %c0_50 = arith.constant 0 : index
    %81 = vector.load %arg3[%c0_49, %c0_50] : memref<128x128xf32, #tpu.memory_space<vmem>>, vector<128x128xf32>
    %cst_51 = arith.constant dense<0.000000e+00> : vector<64x128xf32>
    %82 = tpu.matmul %80, %81, %cst_51 {dimension_numbers = #tpu.dot_dimension_numbers<[1], [0], [0], [1], [0, 0, 1, 1], [], []>} : vector<64x128xf32>, vector<128x128xf32>, vector<64x128xf32> -> vector<64x128xf32>
    %c0_52 = arith.constant 0 : index
    %c0_53 = arith.constant 0 : index
    %83 = vector.load %arg4[%c0_52, %c0_53] : memref<1x128xf32, #tpu.memory_space<vmem>>, vector<1x128xf32>
    %84 = vector.broadcast %83 : vector<1x128xf32> to vector<64x128xf32>
    %85 = arith.addf %82, %84 : vector<64x128xf32>
    %c0_54 = arith.constant 0 : index
    %c0_55 = arith.constant 0 : index
    %c0_56 = arith.constant 0 : index
    %86 = vector.load %arg5[%c0_54, %c0_55, %c0_56] : memref<1x64x128xf32, #tpu.memory_space<vmem>>, vector<1x64x128xf32>
    %87 = vector.shape_cast %86 : vector<1x64x128xf32> to vector<64x128xf32>
    %88 = vector.shape_cast %85 : vector<64x128xf32> to vector<1x64x128xf32>
    tpu.vector_store %arg5[%c0_54, %c0_55, %c0_56], %88 {strides = array<i32>} : memref<1x64x128xf32, #tpu.memory_space<vmem>>, vector<1x64x128xf32>,
    return
  }
  func.func @transform_0(%arg0: i32) -> (i32, i32, i32) {
    %c0_i32 = arith.constant 0 : i32
    %c0_i32_0 = arith.constant 0 : i32
    %c0_i32_1 = arith.constant 0 : i32
    return %arg0, %c0_i32, %c0_i32_0 : i32, i32, i32
  }
  func.func @transform_1(%arg0: i32) -> (i32, i32) {
    %c0_i32 = arith.constant 0 : i32
    %c0_i32_0 = arith.constant 0 : i32
    %c0_i32_1 = arith.constant 0 : i32
    return %c0_i32, %c0_i32_0 : i32, i32
  }
  func.func @transform_2(%arg0: i32) -> (i32, i32) {
    %c0_i32 = arith.constant 0 : i32
    %c0_i32_0 = arith.constant 0 : i32
    %c0_i32_1 = arith.constant 0 : i32
    return %c0_i32, %c0_i32_0 : i32, i32
  }
  func.func @transform_3(%arg0: i32) -> (i32, i32) {
    %c0_i32 = arith.constant 0 : i32
    %c0_i32_0 = arith.constant 0 : i32
    %c0_i32_1 = arith.constant 0 : i32
    return %c0_i32, %c0_i32_0 : i32, i32
  }
  func.func @transform_4(%arg0: i32) -> (i32, i32, i32) {
    %c0_i32 = arith.constant 0 : i32
    %c0_i32_0 = arith.constant 0 : i32
    %c0_i32_1 = arith.constant 0 : i32
    return %arg0, %c0_i32, %c0_i32_0 : i32, i32, i32
  }
}

</mosaic_0001>

<bundles_post_ra>
// kernel: tpu_custom_call.1
= control target key start
LH: loop header
LB: loop body
LE: loop exit
PB: predicated region body
PF: predicated region fallthrough
CT: control target
= control target key end

     0   :  { %9 = vsyncpa [#allocation5], 0  ;;  %s4980_s0 = inlined_call_operand.hbm [shape: f32[2,64,128], index: 0, kind: input, shape index: {}]   ;;  %s4981_s1 = inlined_call_operand.hbm [shape: f32[128,384], index: 1, kind: input, shape index: {}]   ;;  %s4982_s2 = inlined_call_operand.hbm [shape: f32[128,128], index: 2, kind: input, shape index: {}]   ;;  %s4983_s3 = inlined_call_operand.vmem [shape: f32[1,128], index: 3, kind: input, shape index: {}]   ;;  %s4984_s4 = inlined_call_operand.hbm [shape: f32[2,64,128], index: 4, kind: output, shape index: {}]  }
   0x1   :  { %11 = vsyncpa [#allocation5 + $0x1], 0 }
   0x2   :  { %12 = vsyncpa [#allocation8], 0 }
   0x3   :  { %13 = vsyncpa [#allocation6], 0 }
   0x4   :  { %15 = vsyncpa [#allocation6 + $0x1], 0  ;;  %s3744_s15 = smov 0   ;;  %s3746_s16 = smov 0  }
   0x5   :  { %s3748_s17 = smov 0   ;;  %s3750_s18 = smov 0  }
   0x6 LB: > { %s3765_s19 = sadd.s32 4294967295, %s3703_s18   ;;  %s2745_s20 = sadd.s32 4294967294, %s3703_s18   ;;  %s3703_s18 = sphi %s3750_s18, %s5022_s18   ;;  %s3699_s17 = sphi %s3748_s17, %s5021_s17   ;;  %s3695_s16 = sphi %s3746_s16, %s5020_s16   ;;  %s3691_s15 = sphi %s3744_s15, %s5019_s15  }
   0x7   : > { %p41_p0 = scmp.ne.s32.totalorder %s3695_s16, %s3691_s15  ;;  %p4985_p1 = scmp.eq.s32.totalorder %s3765_s19, 0 }
   0x8   : > { %p134_p3 = scmp.eq.s32.totalorder %s2745_s20, 1  ;;  %p2746_p5 = scmp.ge.s32.totalorder %s3703_s18, 1 }
   0x9   : > { %p3774_p4 = por %p4985_p1, %p41_p0  ;;  %p141_p7 = scmp.lt.s32.totalorder %s3703_s18, 3 }
   0xa   : > { %p3779_p6 = por %p134_p3, %p41_p0  ;;  %s3705_s24 = smov [#allocation7]  }
   0xb   : > { %s4989_s21 = scalar_select %p3774_p4, 1, 0 }
   0xc   : > { %s4990_s22 = scalar_select %p3779_p6, 1, 0 }
   0xd   : > { %p3784_p8 = pnand %p2746_p5, %p141_p7  ;;  %s153_s25 = sshll.u32 %s3705_s24, 4  ;;  %s154_s25 = int_to_ptr.vmem [resolvable:$true] %s153_s25 }
   0xe   : > { %s3706_s27 = smov [#allocation9]   ;;  %s3566_s29 = scalar_lea.vmem %s154_s25, 6144 }
   0xf   : > { %s4991_s23 = scalar_select %p3784_p8, 1, 0 }
  0x10   : > { %p3362_p9 = pneg %p3784_p8  ;;  %s166_s28 = sshll.u32 %s3706_s27, 4  ;;  %s167_s28 = int_to_ptr.vmem [resolvable:$true] %s166_s28 }
  0x11   : > { %p3567_p13 = scmp.ne.s32.totalorder %s154_s25, %s3566_s29  ;;  %p3574_p5 = scmp.lt.s32.totalorder %s154_s25, %s154_s25 }
  0x12   : > { %p3793_p11 = pnand %p3362_p9, %p4985_p1  ;;  %p3575_p7 = scmp.lt.s32.totalorder %s3566_s29, %s3566_s29 }
  0x14   : > { %p3557_p12 = pneg %p3793_p11  ;;  %p3576_p10 = por %p3575_p7, %p3574_p5 }
  0x16   : > { %p3569_p0 = pnand %p3567_p13, %p3557_p12 }
  0x18   : > { %p3570_p3 = pneg %p3569_p0 }
  0x1a   : > { %p3577_p9 = pnand %p3576_p10, %p3570_p3 }
  0x1c   : > { %3580 = shalt.err (!%p3577_p9)
}
  0x1d   : > { %s3707_s30 = smov 384   ;;  %s3708_s5 = smov 24  }
  0x1e   : > { %3365 = dma.hbm_to_vmem [thread:$0]  (!%p3793_p11), %s4981_s1, 6144, %s154_s25, [#allocation8], %s3707_s30, %s3707_s30, %s3708_s5  }
  0x1f   : > { %s3592_s8 = scalar_lea.vmem %s167_s28, 2048  ;;  %p3600_p2 = scmp.lt.s32.totalorder %s167_s28, %s167_s28 }
  0x20   : > { %p3593_p1 = scmp.ne.s32.totalorder %s167_s28, %s3592_s8  ;;  %p3601_p6 = scmp.lt.s32.totalorder %s3592_s8, %s3592_s8 }
  0x22   : > { %p3595_p13 = pnand %p3593_p1, %p3557_p12  ;;  %p3602_p5 = por %p3601_p6, %p3600_p2 }
  0x24   : > { %p3596_p0 = pneg %p3595_p13 }
  0x26   : > { %p3603_p10 = pnand %p3602_p5, %p3596_p0 }
  0x28   : > { %3606 = shalt.err (!%p3603_p10)
}
  0x29   : > { %s3709_s9 = smov 128   ;;  %s3710_s10 = smov 8  }
  0x2a   : > { %3368 = dma.hbm_to_vmem [thread:$0]  (!%p3793_p11), %s4982_s2, 2048, %s167_s28, [#allocation8], %s3709_s9, %s3709_s9, %s3710_s10  }
  0x2b   : > { %s3819_s13 = sadd.s32 1, %s3703_s18   ;;  %s28_s20 = sadd.s32 1, %s3699_s17 }
  0x2c   : > { %s25_s14 = ssub.s32 %s3703_s18, %s3819_s13  ;;  %p35_p2 = scmp.ne.s32.totalorder %s3699_s17, %s3695_s16 }
  0x2d   : > { %p26_p1 = scmp.eq.s32.totalorder %s25_s14, 0  ;;  %p36_p6 = scmp.eq.s32.totalorder %s3703_s18, 0 }
  0x2e   : > { %p4993_p3 = scmp.eq.s32.totalorder %s3765_s19, 1  ;;  %p3379_p9 = scmp.lt.s32.totalorder %s3703_s18, 2 }
  0x2f   : > { %s3828_s24 = scalar_select %p26_p1, %s3699_s17, %s28_s20  }
  0x30   : > { %p37_p12 = por %p36_p6, %p35_p2  ;;  %p3832_p7 = por %p4993_p3, %p35_p2 }
  0x31   : > { %s183_s26 = sand.u32 1, %s3699_s17   ;;  %s2860_s28 = sshll.u32 %s3703_s18, 10 }
  0x32   : > { %s4994_s25 = scalar_select %p3832_p7, 1, 0 }
  0x33   : > { %s2750_s27 = sshll.u32 %s183_s26, 6  ;;  %s3842_s5 = scalar_lea.hbm %s4980_s0, %s2860_s28 }
  0x34   : > { %s187_s6 = scalar_lea.vmem [#allocation4], %s2750_s27  ;;  %p3846_p11 = pnand %p3379_p9, %p37_p12 }
  0x35   : > { %s194_s7 = sshll.u32 %s187_s6, 4  ;;  %s3850_s11 = scalar_lea.sflag [#allocation5], %s183_s26  ;;  %s3844_s7 = int_to_ptr.vmem [resolvable:$true] %s194_s7 }
  0x36   : > { %s3607_s12 = scalar_lea.hbm %s3842_s5, 1024  ;;  %p3609_p0 = pneg %p3846_p11 }
  0x37   : > { %p3608_p13 = scmp.ne.s32.totalorder %s3842_s5, %s3607_s12  ;;  %s3612_s27 = scalar_lea.hbm %s4980_s0, 2048 }
  0x38   : > { %p3613_p1 = scmp.lt.s32.totalorder %s3842_s5, %s4980_s0  ;;  %p3614_p2 = scmp.lt.s32.totalorder %s3612_s27, %s3607_s12 }
  0x39   : > { %p3610_p5 = pnand %p3609_p0, %p3608_p13 }
  0x3a   : > { %p3615_p6 = por %p3614_p2, %p3613_p1 }
  0x3b   : > { %p3611_p10 = pneg %p3610_p5 }
  0x3d   : > { %p3616_p12 = pnand %p3615_p6, %p3611_p10 }
  0x3f   : > { %3619 = shalt.err (!%p3616_p12)
}
  0x40   : > { %s3620_s26 = scalar_lea.vmem %s3844_s7, 1024  ;;  %s3711_s30 = smov [#allocation4]  }
  0x41   : > { %p3621_p3 = scmp.ne.s32.totalorder %s3844_s7, %s3620_s26  ;;  %s3625_s6 = sshll.u32 %s3711_s30, 4  ;;  %s3626_s6 = int_to_ptr.vmem [resolvable:$false] %s3625_s6 }
  0x42   : > { %s3627_s14 = scalar_lea.vmem %s3626_s6, 2048  ;;  %p3628_p5 = scmp.lt.s32.totalorder %s3844_s7, %s3626_s6 }
  0x43   : > { %p3623_p9 = pnand %p3621_p3, %p3609_p0  ;;  %p3629_p7 = scmp.lt.s32.totalorder %s3627_s14, %s3620_s26 }
  0x45   : > { %p3624_p13 = pneg %p3623_p9  ;;  %p3630_p4 = por %p3629_p7, %p3628_p5 }
  0x47   : > { %p3631_p8 = pnand %p3630_p4, %p3624_p13 }
  0x49   : > { %3634 = shalt.err (!%p3631_p8)
}
  0x4a   : > { %3372 = dma.hbm_to_vmem [thread:$0]  (!%p3846_p11), %s3842_s5, 1024, %s3844_s7, %s3850_s11, %s3709_s9, %s3709_s9, %s3710_s10  }
  0x4b   : > { %p4996_p0 = scmp.ne.s32.totalorder %s4991_s23, 0 }
  0x4d   : > { %206 = sbr.rel (%p4996_p0) target bundleno = 2117 (0x845), region = 36 }
  0x52   : > { %s3877_s12 = sand.u32 1, %s3695_s16   ;;  %p4997_p4 = scmp.ne.s32.totalorder %s4989_s21, 0 }
  0x53   : > { %s2754_s20 = sshll.u32 %s3877_s12, 6  ;;  %s209_s27 = scalar_lea.sflag [#allocation5], %s3877_s12 }
  0x54   : > { %s3883_s8 = scalar_lea.vmem [#allocation4], %s2754_s20 }
  0x55   : > { %3678 = dma.done.wait (%p4997_p4), %s209_s27, 1024  }
  0x56   : > { %3680 = vsyncadd (%p4997_p4), %s209_s27, 4294966272  ;;  %p4998_p8 = scmp.eq.s32.totalorder %s3765_s19, 0 }
  0x58   : > { %3682 = dma.done.wait (%p4998_p8), [#allocation8], 8192   ;;  %p4999_p7 = pmov %p4998_p8 }
  0x59   : > { %v3712_v0 = vmov 0.0   ;;  %v299_v1 = vld [vmem:[#allocation7 + $0x170] sm:$0xff]  ;;  %v298_v2 = vld [vmem:[#allocation7 + $0x168] sm:$0xff]  ;;  %v296_v3 = vld [vmem:[#allocation7 + $0x158] sm:$0xff]  ;;  %vm586_vm0 = vcmask 261120   ;;  %s3713_s21 = smov 96  }
  0x5a   : > { %3684 = vsyncadd (%p4999_p7), [#allocation8], 4294959104  ;;  %365 = vmatprep.mubr.f32.mxu0 %v3712_v0  ;;  %301 = vmatprep.subr.mxu0 %v299_v1  ;;  %v295_v4 = vld [vmem:[#allocation7 + $0x150] sm:$0xff]  ;;  %v293_v5 = vld [vmem:[#allocation7 + $0x140] sm:$0xff]  ;;  %s3714_s23 = smov 64   ;;  %vm748_vm2 = vcmask 523264  }
  0x5b   : > { %302 = vmatpush1.msra.mxu0 %v298_v2  ;;  %v292_v6 = vld [vmem:[#allocation7 + $0x138] sm:$0xff]  ;;  %v290_v7 = vld [vmem:[#allocation7 + $0x128] sm:$0xff]  ;;  %v289_v8 = vld [vmem:[#allocation7 + $0x120] sm:$0xff]  ;;  %s3715_s9 = smov 32   ;;  %vm1472_vm10 = vcmask 523520   ;;  %vm1979_vm11 = vcmask 785920  }
  0x5c   : > { %303 = vmatprep.subr.mxu0 %v296_v3  ;;  %v287_v9 = vld [vmem:[#allocation7 + $0x110] sm:$0xff]  ;;  %v286_v10 = vld [vmem:[#allocation7 + $0x108] sm:$0xff]  ;;  %v284_v11 = vld [vmem:[#allocation7 + $0xf8] sm:$0xff]  ;;  %vm2486_vm12 = vcmask 1048320   ;;  %s244_s7 = scalar_lea.vmem [#allocation10], %s2754_s20  ;;  %s2861_s28 = sshll.u32 %s3765_s19, 10 }
  0x5d   : > { %304 = vmatpush1.msra.mxu0 %v295_v4  ;;  %v283_v12 = vld [vmem:[#allocation7 + $0xf0] sm:$0xff]  ;;  %v281_v13 = vld [vmem:[#allocation7 + $0xe0] sm:$0xff]  ;;  %v280_v15 = vld [vmem:[#allocation7 + $0xd8] sm:$0xff]  ;;  %s2653_s11 = sshll.u32 %s244_s7, 4  ;;  %s4937_s30 = scalar_lea.hbm %s4984_s4, %s2861_s28  ;;  %s4932_s11 = int_to_ptr.vmem [resolvable:$true] %s2653_s11 }
  0x5e   : > { %305 = vmatprep.subr.mxu0 %v293_v5  ;;  %v3895_v14 = vld [vmem:[%s3883_s8] sm:$0xff]  ;;  %v278_v16 = vld [vmem:[#allocation7 + $0xc8] sm:$0xff]  ;;  %v300_v18 = vld [vmem:[#allocation7 + $0x178] sm:$0xff]  ;;  %s2640_s6 = scalar_lea.sflag [#allocation6], %s3877_s12  ;;  %s3635_s14 = scalar_lea.vmem %s4932_s11, 1024 }
  0x5f   : > { %306 = vmatpush1.msra.mxu0 %v292_v6  ;;  %3070 = vmatprep.mubr.f32.mxu1 %v3895_v14  ;;  %v277_v17 = vld [vmem:[#allocation7 + $0xc0] sm:$0xff]  ;;  %v275_v20 = vld [vmem:[#allocation7 + $0xb0] sm:$0xff]  ;;  %v274_v21 = vld [vmem:[#allocation7 + $0xa8] sm:$0xff]  ;;  %p3636_p11 = scmp.ne.s32.totalorder %s4932_s11, %s3635_s14  ;;  %p5016_p10 = scmp.ne.s32.totalorder %s4994_s25, 0 }
  0x60   : > { %307 = vmatprep.subr.mxu0 %v290_v7  ;;  %v297_v19 = vld [vmem:[#allocation7 + $0x160] sm:$0xff]  ;;  %3038 = vmatprep.subr.mxu1 %v300_v18  ;;  %v294_v22 = vld [vmem:[#allocation7 + $0x148] sm:$0xff]  ;;  %v272_v23 = vld [vmem:[#allocation7 + $0x98] sm:$0xff]  ;;  %s3716_s19 = smov [#allocation10]  }
  0x61   : > { %308 = vmatpush1.msra.mxu0 %v289_v8  ;;  %3039 = vmatpush3.msra.mxu1 %v300_v18  ;;  %v271_v24 = vld [vmem:[#allocation7 + $0x90] sm:$0xff]  ;;  %v269_v26 = vld [vmem:[#allocation7 + $0x80] sm:$0xff]  ;;  %v268_v27 = vld [vmem:[#allocation7 + $0x78] sm:$0xff]  ;;  %p3637_p1 = pnand %p3636_p11, %p5016_p10  ;;  %s3639_s20 = sshll.u32 %s3716_s19, 4  ;;  %s3640_s20 = int_to_ptr.vmem [resolvable:$false] %s3639_s20 }
  0x62   : > { %309 = vmatprep.subr.mxu0 %v287_v9  ;;  %3040 = vmatprep.subr.mxu1 %v297_v19  ;;  %v291_v25 = vld [vmem:[#allocation7 + $0x130] sm:$0xff]  ;;  %v288_v28 = vld [vmem:[#allocation7 + $0x118] sm:$0xff]  ;;  %v266_v29 = vld [vmem:[#allocation7 + $0x68] sm:$0xff]  ;;  %s3641_s27 = scalar_lea.vmem %s3640_s20, 2048  ;;  %p3642_p6 = scmp.lt.s32.totalorder %s4932_s11, %s3640_s20 }
  0x63   : > { %310 = vmatpush1.msra.mxu0 %v286_v10  ;;  %3041 = vmatpush3.msra.mxu1 %v297_v19  ;;  %v265_v30 = vld [vmem:[#allocation7 + $0x60] sm:$0xff]  ;;  %v263_v32 = vld [vmem:[#allocation7 + $0x50] sm:$0xff]  ;;  %v262_v33 = vld [vmem:[#allocation7 + $0x48] sm:$0xff]  ;;  %p3638_p2 = pneg %p3637_p1  ;;  %p3643_p12 = scmp.lt.s32.totalorder %s3641_s27, %s3635_s14 }
  0x64   : > { %311 = vmatprep.subr.mxu0 %v284_v11  ;;  %3042 = vmatprep.subr.mxu1 %v294_v22  ;;  %v285_v31 = vld [vmem:[#allocation7 + $0x100] sm:$0xff]  ;;  %v282_v34 = vld [vmem:[#allocation7 + $0xe8] sm:$0xff]  ;;  %v260_v35 = vld [vmem:[#allocation7 + $0x38] sm:$0xff] }
  0x65   : > { %312 = vmatpush1.msra.mxu0 %v283_v12  ;;  %3043 = vmatpush3.msra.mxu1 %v294_v22  ;;  %v259_v36 = vld [vmem:[#allocation7 + $0x30] sm:$0xff]  ;;  %v257_v38 = vld [vmem:[#allocation7 + $0x20] sm:$0xff]  ;;  %v256_v39 = vld [vmem:[#allocation7 + $0x18] sm:$0xff]  ;;  %p3644_p3 = por %p3643_p12, %p3642_p6 }
  0x66   : > { %313 = vmatprep.subr.mxu0 %v281_v13  ;;  %3044 = vmatprep.subr.mxu1 %v291_v25  ;;  %v279_v37 = vld [vmem:[#allocation7 + $0xd0] sm:$0xff]  ;;  %v276_v40 = vld [vmem:[#allocation7 + $0xb8] sm:$0xff]  ;;  %v254_v41 = vld [vmem:[#allocation7 + $0x8] sm:$0xff] }
  0x67   : > { %314 = vmatpush1.msra.mxu0 %v280_v15  ;;  %3045 = vmatpush3.msra.mxu1 %v291_v25  ;;  %v253_v42 = vld [vmem:[#allocation7] sm:$0xff]  ;;  %v270_v44 = vld [vmem:[#allocation7 + $0x88] sm:$0xff]  ;;  %v267_v45 = vld [vmem:[#allocation7 + $0x70] sm:$0xff]  ;;  %p3645_p9 = pnand %p3644_p3, %p3638_p2 }
  0x68   : > { %315 = vmatprep.subr.mxu0 %v278_v16  ;;  %3046 = vmatprep.subr.mxu1 %v288_v28  ;;  %v273_v43 = vld [vmem:[#allocation7 + $0xa0] sm:$0xff]  ;;  %v246_v46 = vld [vmem:[%s3883_s8 + $0x8] sm:$0xff]  ;;  %v264_v47 = vld [vmem:[#allocation7 + $0x58] sm:$0xff] }
  0x69   : > { %316 = vmatpush1.msra.mxu0 %v277_v17  ;;  %3047 = vmatpush3.msra.mxu1 %v288_v28  ;;  %v261_v48 = vld [vmem:[#allocation7 + $0x40] sm:$0xff]  ;;  %v247_v49 = vld [vmem:[%s3883_s8 + $0x10] sm:$0xff]  ;;  %v258_v50 = vld [vmem:[#allocation7 + $0x28] sm:$0xff] }
  0x6a   : > { %317 = vmatprep.subr.mxu0 %v275_v20  ;;  %3048 = vmatprep.subr.mxu1 %v285_v31  ;;  %v255_v51 = vld [vmem:[#allocation7 + $0x10] sm:$0xff]  ;;  %v248_v52 = vld [vmem:[%s3883_s8 + $0x18] sm:$0xff]  ;;  %v249_v53 = vld [vmem:[%s3883_s8 + $0x20] sm:$0xff] }
  0x6b   : > { %318 = vmatpush1.msra.mxu0 %v274_v21  ;;  %3049 = vmatpush3.msra.mxu1 %v285_v31  ;;  %v250_v54 = vld [vmem:[%s3883_s8 + $0x28] sm:$0xff]  ;;  %v251_v55 = vld [vmem:[%s3883_s8 + $0x30] sm:$0xff]  ;;  %v252_v56 = vld [vmem:[%s3883_s8 + $0x38] sm:$0xff] }
  0x6c   : > { %319 = vmatprep.subr.mxu0 %v272_v23  ;;  %3050 = vmatprep.subr.mxu1 %v282_v34 }
  0x6d   : > { %320 = vmatpush1.msra.mxu0 %v271_v24  ;;  %3051 = vmatpush3.msra.mxu1 %v282_v34 }
  0x6e   : > { %321 = vmatprep.subr.mxu0 %v269_v26  ;;  %3052 = vmatprep.subr.mxu1 %v279_v37 }
  0x6f   : > { %322 = vmatpush1.msra.mxu0 %v268_v27  ;;  %3053 = vmatpush3.msra.mxu1 %v279_v37 }
  0x70   : > { %323 = vmatprep.subr.mxu0 %v266_v29  ;;  %3054 = vmatprep.subr.mxu1 %v276_v40  ;;  %v543_v29 = vlaneseq }
  0x71   : > { %324 = vmatpush1.msra.mxu0 %v265_v30  ;;  %3055 = vmatpush3.msra.mxu1 %v276_v40 }
  0x72   : > { %325 = vmatprep.subr.mxu0 %v263_v32  ;;  %3056 = vmatprep.subr.mxu1 %v273_v43  ;;  %v4077_v30 = vshrl.u32 %v543_v29, 7  ;;  %v4082_v32 = vand.u32 127, %v543_v29 }
  0x73   : > { %326 = vmatpush1.msra.mxu0 %v262_v33  ;;  %3057 = vmatpush3.msra.mxu1 %v273_v43 }
  0x74   : > { %327 = vmatprep.subr.mxu0 %v260_v35  ;;  %3058 = vmatprep.subr.mxu1 %v270_v44  ;;  %v4080_v31 = vadd.s32 8, %v4077_v30  ;;  %v4087_v33 = vadd.s32 24, %v4077_v30  ;;  %vm554_vm3 = vcmp.le.s32.totalorder %v4082_v32, %v4077_v30  ;;  %v4092_v35 = vadd.s32 16, %v4077_v30 }
  0x75   : > { %328 = vmatpush1.msra.mxu0 %v259_v36  ;;  %3059 = vmatpush3.msra.mxu1 %v270_v44 }
  0x76   : > { %329 = vmatprep.subr.mxu0 %v257_v38  ;;  %3060 = vmatprep.subr.mxu1 %v267_v45  ;;  %vm555_vm1 = vcmp.le.s32.totalorder %v4082_v32, %v4080_v31  ;;  %vm557_vm4 = vcmp.le.s32.totalorder %v4082_v32, %v4087_v33  ;;  %vm556_vm5 = vcmp.le.s32.totalorder %v4082_v32, %v4092_v35 }
  0x77   : > { %330 = vmatpush1.msra.mxu0 %v256_v39  ;;  %3061 = vmatpush3.msra.mxu1 %v267_v45 }
  0x78   : > { %331 = vmatprep.subr.mxu0 %v254_v41  ;;  %3062 = vmatprep.subr.mxu1 %v264_v47  ;;  %v4111_v41 = vadd.s32 40, %v4077_v30 }
  0x79   : > { %332 = vmatpush1.msra.mxu0 %v253_v42  ;;  %3063 = vmatpush3.msra.mxu1 %v264_v47 }
  0x7a   : > { %366 = vmatmul.mubr.f32.vlgmr.msra.gmra.mxu0 %v3895_v14  ;;  %3064 = vmatprep.subr.mxu1 %v261_v48  ;;  %vm559_vm6 = vcmp.le.s32.totalorder %v4082_v32, %v4111_v41 }
  0x7b   : > { %371 = vmatprep.mubr.f32.mxu0 %v3712_v0  ;;  %3065 = vmatpush3.msra.mxu1 %v261_v48  ;;  %v4130_v48 = vadd.s32 56, %v4077_v30 }
  0x7c   : > { %3066 = vmatprep.subr.mxu1 %v258_v50 }
  0x7d   : > { %3067 = vmatpush3.msra.mxu1 %v258_v50  ;;  %vm561_vm7 = vcmp.le.s32.totalorder %v4082_v32, %v4130_v48 }
  0x7e   : > { %372 = vmatmul.mubr.f32.gmra.mxu0 %v246_v46  ;;  %3068 = vmatprep.subr.mxu1 %v255_v51 }
  0x7f   : > { %377 = vmatprep.mubr.f32.mxu0 %v3712_v0  ;;  %3069 = vmatpush3.msra.mxu1 %v255_v51 }
  0x80   : > { %3071 = vmatmul.mubr.f32.vlgmr.msra.gmra.mxu1 %v246_v46 }
  0x81   : > { %3073 = vmatprep.mubr.f32.mxu1 %v247_v49 }
  0x82   : > { %378 = vmatmul.mubr.f32.gmra.mxu0 %v247_v49 }
  0x83   : > { %383 = vmatprep.mubr.f32.mxu0 %v3712_v0 }
  0x84   : > { %3074 = vmatmul.mubr.f32.gmra.mxu1 %v248_v52 }
  0x85   : > { %3076 = vmatprep.mubr.f32.mxu1 %v249_v53 }
  0x86   : > { %384 = vmatmul.mubr.f32.gmra.mxu0 %v248_v52 }
  0x87   : > { %389 = vmatprep.mubr.f32.mxu0 %v3712_v0 }
  0x88   : > { %3077 = vmatmul.mubr.f32.gmra.mxu1 %v250_v54 }
  0x89   : > { %3079 = vmatprep.mubr.f32.mxu1 %v251_v55 }
  0x8a   : > { %390 = vmatmul.mubr.f32.gmra.mxu0 %v249_v53 }
  0x8b   : > { %395 = vmatprep.mubr.f32.mxu0 %v3712_v0 }
  0x8c   : > { %3080 = vmatmul.mubr.f32.gmra.mxu1 %v252_v56 }
  0x8e   : > { %396 = vmatmul.mubr.f32.gmra.mxu0 %v250_v54 }
  0x8f   : > { %401 = vmatprep.mubr.f32.mxu0 %v3712_v0 }
  0x92   : > { %402 = vmatmul.mubr.f32.gmra.mxu0 %v251_v55 }
  0x93   : > { %407 = vmatprep.mubr.f32.mxu0 %v3712_v0 }
  0x96   : > { %408 = vmatmul.mubr.f32.gmra.mxu0 %v252_v56  ;;  %v4161_v56 = vadd.s32 32, %v4077_v30 }
  0x98   : > { %vm558_vm8 = vcmp.le.s32.totalorder %v4082_v32, %v4161_v56 }
 0x13a   : > { %v3913_v57 = vpop.f32.mrf.mxu0 }
 0x13b   : > { %3098 = vmatprep.mubr.msk.f32.mxu0 %vm586_vm0, %v3913_v57 }
 0x13c   : > { %v3917_v58 = vpop.f32.mrf.mxu0 }
 0x13d   : > { %1030 = vrot.lane.b32.xlu0 %v3917_v58, %s3713_s21 }
 0x13e   : > { %v3921_v59 = vpop.f32.mrf.mxu0 }
 0x140   : > { %v3923_v60 = vpop.f32.mrf.mxu0  ;;  %v3935_v0 = vpop.f32.mrf.mxu1 }
 0x141   : > { %1032 = vrot.lane.b32.xlu0 %v3923_v60, %s3713_s21 }
 0x142   : > { %v3927_v61 = vpop.f32.mrf.mxu0  ;;  %v3941_v2 = vpop.f32.mrf.mxu1 }
 0x144   : > { %v3929_v62 = vpop.f32.mrf.mxu0  ;;  %v3945_v4 = vpop.f32.mrf.mxu1 }
 0x145   : > { %1034 = vrot.lane.b32.xlu0 %v3929_v62, %s3713_s21 }
 0x146   : > { %v3933_v63 = vpop.f32.mrf.mxu0  ;;  %v3951_v6 = vpop.f32.mrf.mxu1 }
 0x148   : > { %v3937_v1 = vpop.f32.mrf.mxu0  ;;  %v3955_v8 = vpop.f32.mrf.mxu1 }
 0x149   : > { %1036 = vrot.lane.b32.xlu0 %v3937_v1, %s3713_s21 }
 0x14a   : > { %v3943_v3 = vpop.f32.mrf.mxu0  ;;  %v3961_v10 = vpop.f32.mrf.mxu1 }
 0x14c   : > { %v3947_v5 = vpop.f32.mrf.mxu0  ;;  %v3965_v12 = vpop.f32.mrf.mxu1 }
 0x14d   : > { %1038 = vrot.lane.b32.xlu1 %v3947_v5, %s3713_s21  ;;  %3110 = vmatprep.subr.mxu1 %v3965_v12 }
 0x14e   : > { %v3953_v7 = vpop.f32.mrf.mxu0  ;;  %v3972_v14 = vpop.f32.mrf.mxu1  ;;  %3111 = vmatpush3.msra.mxu1 %v3965_v12 }
 0x14f   : > { %3112 = vmatprep.subr.mxu1 %v3972_v14 }
 0x150   : > { %v3957_v9 = vpop.f32.mrf.mxu0  ;;  %3113 = vmatpush3.msra.mxu1 %v3972_v14 }
 0x151   : > { %1545 = vrot.lane.b32.xlu1 %v3947_v5, %s3714_s23  ;;  %3114 = vmatprep.subr.mxu1 %v3955_v8 }
 0x152   : > { %v3963_v11 = vpop.f32.mrf.mxu0  ;;  %3115 = vmatpush3.msra.mxu1 %v3955_v8 }
 0x153   : > { %3116 = vmatprep.subr.mxu1 %v3961_v10 }
 0x154   : > { %v3967_v13 = vpop.f32.mrf.mxu0  ;;  %3117 = vmatpush3.msra.mxu1 %v3961_v10 }
 0x155   : > { %1040 = vrot.lane.b32.xlu1 %v3957_v9, %s3713_s21  ;;  %3118 = vmatprep.subr.mxu1 %v3945_v4 }
 0x156   : > { %v3975_v15 = vpop.f32.mrf.mxu0  ;;  %3119 = vmatpush3.msra.mxu1 %v3945_v4 }
 0x157   : > { %3120 = vmatprep.subr.mxu1 %v3951_v6 }
 0x158   : > { %v3979_v16 = vpop.f32.mrf.mxu0  ;;  %3121 = vmatpush3.msra.mxu1 %v3951_v6 }
 0x159   : > { %1547 = vrot.lane.b32.xlu1 %v3957_v9, %s3714_s23  ;;  %1044 = vrot.lane.b32.xlu0 %v3979_v16, %s3713_s21 }
 0x15a   : > { %3082 = vmatprep.subr.msk.mxu0 %vm586_vm0, %v3979_v16  ;;  %3122 = vmatprep.subr.mxu1 %v3935_v0 }
 0x15b   : > { %3083 = vmatpush3.xpose.msk.msra.mxu0 %vm586_vm0, %v3979_v16  ;;  %3123 = vmatpush3.msra.mxu1 %v3935_v0 }
 0x15c   : > { %3084 = vmatprep.subr.msk.mxu0 %vm586_vm0, %v3967_v13  ;;  %3124 = vmatprep.subr.mxu1 %v3941_v2 }
 0x15d   : > { %1042 = vrot.lane.b32.xlu1 %v3967_v13, %s3713_s21  ;;  %3125 = vmatpush3.msra.mxu1 %v3941_v2 }
 0x15f   : > { %3085 = vmatpush3.xpose.msk.msra.mxu0 %vm586_vm0, %v3967_v13 }
 0x160   : > { %3086 = vmatprep.subr.msk.mxu0 %vm586_vm0, %v3957_v9 }
 0x161   : > { %1549 = vrot.lane.b32.xlu1 %v3967_v13, %s3714_s23 }
 0x163   : > { %3087 = vmatpush3.xpose.msk.msra.mxu0 %vm586_vm0, %v3957_v9 }
 0x164   : > { %3088 = vmatprep.subr.msk.mxu0 %vm586_vm0, %v3947_v5 }
 0x165   : > { %1551 = vrot.lane.b32.xlu1 %v3979_v16, %s3714_s23 }
 0x167   : > { %3089 = vmatpush3.xpose.msk.msra.mxu0 %vm586_vm0, %v3947_v5 }
 0x168   : > { %3090 = vmatprep.subr.msk.mxu0 %vm586_vm0, %v3937_v1 }
 0x169   : > { %1008 = vrot.lane.b32.xlu1 %v3921_v59, %s3713_s21 }
 0x16b   : > { %3091 = vmatpush3.xpose.msk.msra.mxu0 %vm586_vm0, %v3937_v1 }
 0x16c   : > { %3092 = vmatprep.subr.msk.mxu0 %vm586_vm0, %v3929_v62 }
 0x16f   : > { %3093 = vmatpush3.xpose.msk.msra.mxu0 %vm586_vm0, %v3929_v62 }
 0x170   : > { %3094 = vmatprep.subr.msk.mxu0 %vm586_vm0, %v3923_v60 }
 0x173   : > { %3095 = vmatpush3.xpose.msk.msra.mxu0 %vm586_vm0, %v3923_v60 }
 0x174   : > { %3096 = vmatprep.subr.msk.mxu0 %vm586_vm0, %v3917_v58 }
 0x177   : > { %3097 = vmatpush3.xpose.msk.msra.mxu0 %vm586_vm0, %v3917_v58 }
 0x17a   : > { %3099 = vmatmul.mubr.msk.f32.vlgmr.msra.gmra.mxu0 %vm586_vm0, %v3921_v59 }
 0x17b   : > { %3101 = vmatprep.mubr.msk.f32.mxu0 %vm586_vm0, %v3927_v61 }
 0x17e   : > { %3102 = vmatmul.mubr.msk.f32.gmra.mxu0 %vm586_vm0, %v3933_v63 }
 0x17f   : > { %3104 = vmatprep.mubr.msk.f32.mxu0 %vm586_vm0, %v3943_v3 }
 0x182   : > { %3105 = vmatmul.mubr.msk.f32.gmra.mxu0 %vm586_vm0, %v3953_v7 }
 0x183   : > { %3107 = vmatprep.mubr.msk.f32.mxu0 %vm586_vm0, %v3963_v11 }
 0x186   : > { %3108 = vmatmul.mubr.msk.f32.gmra.mxu0 %vm586_vm0, %v3975_v15 }
 0x1af   : > { %v4051_v17 = vpop.permute.xlu0 %1030 }
 0x1b3   : > { %v4053_v18 = vpop.permute.xlu0 %1032 }
 0x1b7   : > { %v4057_v20 = vpop.permute.xlu0 %1034 }
 0x1bb   : > { %v4059_v22 = vpop.permute.xlu0 %1036 }
 0x1bf   : > { %v4055_v19 = vpop.permute.xlu1 %1038 }
 0x1c3   : > { %v1546_v21 = vpop.permute.xlu1 %1545 }
 0x1c7   : > { %v4061_v23 = vpop.permute.xlu1 %1040 }
 0x1cb   : > { %v1548_v24 = vpop.permute.xlu1 %1547  ;;  %v4063_v25 = vpop.permute.xlu0 %1044 }
 0x1cc   : > { %3138 = vmatprep.subr.msk.mxu1 %vm586_vm0, %v4063_v25 }
 0x1cf   : > { %v4067_v26 = vpop.permute.xlu1 %1042 }
 0x1d3   : > { %v1550_v27 = vpop.permute.xlu1 %1549 }
 0x1d7   : > { %v1552_v28 = vpop.permute.xlu1 %1551 }
 0x1d8   : > { %3194 = vmatprep.subr.msk.mxu0 %vm586_vm0, %v1552_v28 }
 0x1d9   : > { %3195 = vmatpush3.xpose.msk.msra.mxu0 %vm586_vm0, %v1552_v28 }
 0x1da   : > { %3196 = vmatprep.subr.msk.mxu0 %vm586_vm0, %v1550_v27 }
 0x1dd   : > { %3197 = vmatpush3.xpose.msk.msra.mxu0 %vm586_vm0, %v1550_v27 }
 0x1de   : > { %3198 = vmatprep.subr.msk.mxu0 %vm586_vm0, %v1548_v24 }
 0x1e1   : > { %3199 = vmatpush3.xpose.msk.msra.mxu0 %vm586_vm0, %v1548_v24 }
 0x1e2   : > { %3200 = vmatprep.subr.msk.mxu0 %vm586_vm0, %v1546_v21 }
 0x1e5   : > { %3201 = vmatpush3.xpose.msk.msra.mxu0 %vm586_vm0, %v1546_v21  ;;  %v4168_v21 = vadd.s32 48, %v4077_v30 }
 0x1e7   : > { %vm560_vm9 = vcmp.le.s32.totalorder %v4082_v32, %v4168_v21 }
 0x23a   : > { %v3100_v34 = vpop.f32.mrf.mxu0 }
 0x23b   : > { %v4097_v36 = vsel %vm555_vm1, %v3100_v34, -inf }
 0x23c   : > { %v701_v37 = vpop.f32.mrf.mxu0  ;;  %v752_v38 = vsel %vm748_vm2, %v4097_v36, -inf }
 0x23d   : > { %v4106_v39 = vsel %vm554_vm3, %v701_v37, -inf  ;;  %753 = vmax.xlane.f32.xlu0 %v752_v38  ;;  %v4238_v37 = vpop.permute.xlu1 %1008 }
 0x23e   : > { %v3103_v40 = vpop.f32.mrf.mxu0  ;;  %v749_v44 = vsel %vm748_vm2, %v4106_v39, -inf }
 0x23f   : > { %v4116_v42 = vsel %vm557_vm4, %v3103_v40, -inf }
 0x240   : > { %v711_v43 = vpop.f32.mrf.mxu0  ;;  %v758_v45 = vsel %vm748_vm2, %v4116_v42, -inf }
 0x241   : > { %v4125_v46 = vsel %vm556_vm5, %v711_v43, -inf  ;;  %750 = vmax.xlane.f32.xlu0 %v749_v44  ;;  %759 = vmax.xlane.f32.xlu1 %v758_v45 }
 0x242   : > { %v3106_v47 = vpop.f32.mrf.mxu0  ;;  %v755_v50 = vsel %vm748_vm2, %v4125_v46, -inf }
 0x243   : > { %v4137_v51 = vsel %vm559_vm6, %v3106_v47, -inf }
 0x244   : > { %v721_v49 = vpop.f32.mrf.mxu0  ;;  %v764_v53 = vsel %vm748_vm2, %v4137_v51, -inf }
 0x245   : > { %756 = vmax.xlane.f32.xlu1 %v755_v50  ;;  %v4173_v24 = vsel %vm558_vm8, %v721_v49, -inf }
 0x246   : > { %v3109_v52 = vpop.f32.mrf.mxu0  ;;  %v761_v28 = vsel %vm748_vm2, %v4173_v24, -inf }
 0x247   : > { %v4146_v54 = vsel %vm561_vm7, %v3109_v52, -inf }
 0x248   : > { %v770_v55 = vsel %vm748_vm2, %v4146_v54, -inf  ;;  %v731_v27 = vpop.f32.mrf.mxu0 }
 0x249   : > { %765 = vmax.xlane.f32.xlu1 %v764_v53  ;;  %v4184_v29 = vsel %vm560_vm9, %v731_v27, -inf }
 0x24a   : > { %v767_v34 = vsel %vm748_vm2, %v4184_v29, -inf }
 0x24d   : > { %771 = vmax.xlane.f32.xlu1 %v770_v55 }
 0x257   : > { %1006 = vrot.lane.b32.xlu0 %v3913_v57, %s3713_s21 }
 0x25e   : > { %1010 = vrot.lane.b32.xlu1 %v3927_v61, %s3713_s21 }
 0x262   : > { %1541 = vrot.lane.b32.xlu1 %v3929_v62, %s3714_s23 }
 0x266   : > { %1016 = vrot.lane.b32.xlu1 %v3953_v7, %s3713_s21 }
 0x26a   : > { %1018 = vrot.lane.b32.xlu1 %v3963_v11, %s3713_s21 }
 0x26e   : > { %1537 = vrot.lane.b32.xlu1 %v3917_v58, %s3714_s23 }
 0x272   : > { %1515 = vrot.lane.b32.xlu1 %v3921_v59, %s3714_s23 }
 0x276   : > { %762 = vmax.xlane.f32.xlu0 %v761_v28  ;;  %1519 = vrot.lane.b32.xlu1 %v3933_v63, %s3714_s23 }
 0x27a   : > { %1523 = vrot.lane.b32.xlu1 %v3953_v7, %s3714_s23  ;;  %768 = vmax.xlane.f32.xlu0 %v767_v34 }
 0x27e   : > { %1527 = vrot.lane.b32.xlu1 %v3975_v15, %s3714_s23 }
 0x282   : > { %1283 = vrot.lane.b32.xlu1 %v3972_v14, %s3713_s21 }
 0x286   : > { %1279 = vrot.lane.b32.xlu1 %v3961_v10, %s3713_s21 }
 0x28a   : > { %1277 = vrot.lane.b32.xlu1 %v3945_v4, %s3713_s21 }
 0x28e   : > { %1275 = vrot.lane.b32.xlu1 %v3951_v6, %s3713_s21 }
 0x290   : > { %1543 = vrot.lane.b32.xlu0 %v3937_v1, %s3714_s23 }
 0x292   : > { %1271 = vrot.lane.b32.xlu1 %v3941_v2, %s3713_s21 }
 0x294   : > { %1012 = vrot.lane.b32.xlu0 %v3933_v63, %s3713_s21 }
 0x296   : > { %1790 = vrot.lane.b32.xlu1 %v3972_v14, %s3714_s23 }
 0x298   : > { %1014 = vrot.lane.b32.xlu0 %v3943_v3, %s3713_s21 }
 0x29a   : > { %1784 = vrot.lane.b32.xlu1 %v3945_v4, %s3714_s23 }
 0x29c   : > { %1539 = vrot.lane.b32.xlu0 %v3923_v60, %s3714_s23 }
 0x29e   : > { %1780 = vrot.lane.b32.xlu1 %v3935_v0, %s3714_s23 }
 0x2a0   : > { %1020 = vrot.lane.b32.xlu0 %v3975_v15, %s3713_s21 }
 0x2a4   : > { %1513 = vrot.lane.b32.xlu0 %v3913_v57, %s3714_s23 }
 0x2a8   : > { %1517 = vrot.lane.b32.xlu0 %v3927_v61, %s3714_s23 }
 0x2ac   : > { %1521 = vrot.lane.b32.xlu0 %v3943_v3, %s3714_s23 }
 0x2b0   : > { %1525 = vrot.lane.b32.xlu0 %v3963_v11, %s3714_s23 }
 0x2b4   : > { %1285 = vrot.lane.b32.xlu0 %v3965_v12, %s3713_s21 }
 0x2b8   : > { %1281 = vrot.lane.b32.xlu0 %v3955_v8, %s3713_s21 }
 0x2bc   : > { %1273 = vrot.lane.b32.xlu0 %v3935_v0, %s3713_s21 }
 0x2c0   : > { %1792 = vrot.lane.b32.xlu0 %v3965_v12, %s3714_s23 }
 0x2c4   : > { %1788 = vrot.lane.b32.xlu0 %v3955_v8, %s3714_s23 }
 0x2c6   : > { %v754_v38 = vpop.xlane.xlu0 %753 }
 0x2c7   : > { %v774_v40 = vsub.f32 %v4097_v36, %v754_v38 }
 0x2c8   : > { %1786 = vrot.lane.b32.xlu0 %v3961_v10, %s3714_s23 }
 0x2c9   : > { %v783_v47 = vmul.f32 1.442695, %v774_v40 }
 0x2ca   : > { %v751_v43 = vpop.xlane.xlu0 %750  ;;  %v760_v44 = vpop.xlane.xlu1 %759 }
 0x2cb   : > { %v773_v45 = vsub.f32 %v4106_v39, %v751_v43  ;;  %v776_v49 = vsub.f32 %v4116_v42, %v760_v44 }
 0x2cc   : > { %1782 = vrot.lane.b32.xlu0 %v3951_v6, %s3714_s23 }
 0x2cd   : > { %v781_v50 = vmul.f32 1.442695, %v773_v45  ;;  %v787_v36 = vmul.f32 1.442695, %v776_v49 }
 0x2ce   : > { %v757_v52 = vpop.xlane.xlu1 %756 }
 0x2cf   : > { %3427 = vpow2.f32 %v781_v50  ;;  %v775_v53 = vsub.f32 %v4125_v46, %v757_v52 }
 0x2d0   : > { %3429 = vpow2.f32 %v783_v47 }
 0x2d1   : > { %v785_v55 = vmul.f32 1.442695, %v775_v53 }
 0x2d2   : > { %v766_v46 = vpop.xlane.xlu1 %765 }
 0x2d3   : > { %3431 = vpow2.f32 %v785_v55 }
 0x2d4   : > { %3433 = vpow2.f32 %v787_v36 }
 0x2dc   : > { %v4248_v27 = vpop.eup %3427 }
 0x2dd   : > { %v4250_v28 = vpop.eup %3429  ;;  %3126 = vmatprep.mubr.msk.f32.mxu1 %vm748_vm2, %v4248_v27 }
 0x2de   : > { %3127 = vmatmul.mubr.msk.f32.vlgmr.msra.gmra.mxu1 %vm748_vm2, %v4250_v28 }
 0x2df   : > { %3139 = vmatpush3.xpose.msk.msra.mxu1 %vm586_vm0, %v4063_v25  ;;  %v772_v25 = vpop.xlane.xlu1 %771 }
 0x2e0   : > { %v4258_v39 = vpop.eup %3431  ;;  %3140 = vmatprep.subr.msk.mxu1 %vm586_vm0, %v4067_v26  ;;  %v780_v44 = vsub.f32 %v4146_v54, %v772_v25 }
 0x2e1   : > { %v4262_v42 = vpop.eup %3433  ;;  %3129 = vmatprep.mubr.msk.f32.mxu1 %vm748_vm2, %v4258_v39 }
 0x2e2   : > { %3130 = vmatmul.mubr.msk.f32.gmra.mxu1 %vm748_vm2, %v4262_v42  ;;  %v795_v49 = vmul.f32 1.442695, %v780_v44 }
 0x2e3   : > { %3141 = vmatpush3.xpose.msk.msra.mxu1 %vm586_vm0, %v4067_v26  ;;  %v1011_v34 = vpop.permute.xlu1 %1010 }
 0x2e4   : > { %3142 = vmatprep.subr.msk.mxu1 %vm586_vm0, %v4061_v23 }
 0x2e7   : > { %3143 = vmatpush3.xpose.msk.msra.mxu1 %vm586_vm0, %v4061_v23  ;;  %v1542_v26 = vpop.permute.xlu1 %1541  ;;  %v1007_v23 = vpop.permute.xlu0 %1006 }
 0x2e8   : > { %3144 = vmatprep.subr.msk.mxu1 %vm586_vm0, %v4055_v19 }
 0x2eb   : > { %3145 = vmatpush3.xpose.msk.msra.mxu1 %vm586_vm0, %v4055_v19  ;;  %v1017_v19 = vpop.permute.xlu1 %1016 }
 0x2ec   : > { %3146 = vmatprep.subr.msk.mxu1 %vm586_vm0, %v4059_v22 }
 0x2ef   : > { %3147 = vmatpush3.xpose.msk.msra.mxu1 %vm586_vm0, %v4059_v22  ;;  %v778_v22 = vsub.f32 %v4137_v51, %v766_v46  ;;  %v1019_v38 = vpop.permute.xlu1 %1018 }
 0x2f0   : > { %3148 = vmatprep.subr.msk.mxu1 %vm586_vm0, %v4057_v20 }
 0x2f1   : > { %v791_v43 = vmul.f32 1.442695, %v778_v22 }
 0x2f3   : > { %3149 = vmatpush3.xpose.msk.msra.mxu1 %vm586_vm0, %v4057_v20  ;;  %v1538_v50 = vpop.permute.xlu1 %1537 }
 0x2f4   : > { %3150 = vmatprep.subr.msk.mxu1 %vm586_vm0, %v4053_v18 }
 0x2f7   : > { %3151 = vmatpush3.xpose.msk.msra.mxu1 %vm586_vm0, %v4053_v18 }
 0x2f8   : > { %3152 = vmatprep.subr.msk.mxu1 %vm586_vm0, %v4051_v17 }
 0x2fb   : > { %3153 = vmatpush3.xpose.msk.msra.mxu1 %vm586_vm0, %v4051_v17  ;;  %v1516_v17 = vpop.permute.xlu1 %1515 }
 0x2ff   : > { %v763_v40 = vpop.xlane.xlu0 %762 }
 0x300   : > { %v777_v20 = vsub.f32 %v4173_v24, %v763_v40 }
 0x302   : > { %v789_v45 = vmul.f32 1.442695, %v777_v20 }
 0x303   : > { %v769_v47 = vpop.xlane.xlu0 %768 }
 0x304   : > { %3435 = vpow2.f32 %v789_v45  ;;  %v779_v18 = vsub.f32 %v4184_v29, %v769_v47  ;;  %v1520_v29 = vpop.permute.xlu1 %1519 }
 0x305   : > { %3437 = vpow2.f32 %v791_v43 }
 0x306   : > { %v793_v52 = vmul.f32 1.442695, %v779_v18 }
 0x307   : > { %v1544_v53 = vpop.permute.xlu0 %1543 }
 0x308   : > { %3439 = vpow2.f32 %v793_v52  ;;  %3202 = vmatprep.subr.msk.mxu0 %vm586_vm0, %v1544_v53 }
 0x309   : > { %3441 = vpow2.f32 %v795_v49  ;;  %3203 = vmatpush3.xpose.msk.msra.mxu0 %vm586_vm0, %v1544_v53 }
 0x30a   : > { %3204 = vmatprep.subr.msk.mxu0 %vm586_vm0, %v1542_v26 }
 0x30b   : > { %v1013_v51 = vpop.permute.xlu0 %1012 }
 0x30d   : > { %3205 = vmatpush3.xpose.msk.msra.mxu0 %vm586_vm0, %v1542_v26  ;;  %v1524_v26 = vpop.permute.xlu1 %1523 }
 0x30f   : > { %v1015_v54 = vpop.permute.xlu0 %1014 }
 0x311   : > { %v4302_v24 = vpop.eup %3435  ;;  %v1528_v20 = vpop.permute.xlu1 %1527 }
 0x312   : > { %v4304_v36 = vpop.eup %3437  ;;  %3132 = vmatprep.mubr.msk.f32.mxu1 %vm748_vm2, %v4302_v24 }
 0x313   : > { %3133 = vmatmul.mubr.msk.f32.gmra.mxu1 %vm748_vm2, %v4304_v36  ;;  %v1540_v55 = vpop.permute.xlu0 %1539 }
 0x314   : > { %3206 = vmatprep.subr.msk.mxu0 %vm586_vm0, %v1540_v55 }
 0x315   : > { %v4311_v46 = vpop.eup %3439  ;;  %3207 = vmatpush3.xpose.msk.msra.mxu0 %vm586_vm0, %v1540_v55 }
 0x316   : > { %v4314_v25 = vpop.eup %3441  ;;  %3135 = vmatprep.mubr.msk.f32.mxu1 %vm748_vm2, %v4311_v46  ;;  %3208 = vmatprep.subr.msk.mxu0 %vm586_vm0, %v1538_v50 }
 0x317   : > { %3136 = vmatmul.mubr.msk.f32.gmra.mxu1 %vm748_vm2, %v4314_v25  ;;  %v1021_v22 = vpop.permute.xlu0 %1020 }
 0x318   : > { %3154 = vmatprep.mubr.msk.f32.mxu1 %vm586_vm0, %v1007_v23  ;;  %v1284_v23 = vpop.permute.xlu1 %1283 }
 0x319   : > { %3209 = vmatpush3.xpose.msk.msra.mxu0 %vm586_vm0, %v1538_v50 }
 0x31b   : > { %3155 = vmatmul.mubr.msk.f32.vlgmr.msra.gmra.mxu1 %vm586_vm0, %v4238_v37  ;;  %v1514_v40 = vpop.permute.xlu0 %1513 }
 0x31c   : > { %3157 = vmatprep.mubr.msk.f32.mxu1 %vm586_vm0, %v1011_v34  ;;  %3210 = vmatprep.mubr.msk.f32.mxu0 %vm586_vm0, %v1514_v40  ;;  %v1280_v44 = vpop.permute.xlu1 %1279 }
 0x31d   : > { %3211 = vmatmul.mubr.msk.f32.vlgmr.msra.gmra.mxu0 %vm586_vm0, %v1516_v17 }
 0x31f   : > { %3158 = vmatmul.mubr.msk.f32.gmra.mxu1 %vm586_vm0, %v1013_v51  ;;  %v1518_v43 = vpop.permute.xlu0 %1517 }
 0x320   : > { %3160 = vmatprep.mubr.msk.f32.mxu1 %vm586_vm0, %v1015_v54  ;;  %3213 = vmatprep.mubr.msk.f32.mxu0 %vm586_vm0, %v1518_v43  ;;  %v1278_v47 = vpop.permute.xlu1 %1277 }
 0x321   : > { %3214 = vmatmul.mubr.msk.f32.gmra.mxu0 %vm586_vm0, %v1520_v29 }
 0x323   : > { %3161 = vmatmul.mubr.msk.f32.gmra.mxu1 %vm586_vm0, %v1017_v19  ;;  %v1522_v37 = vpop.permute.xlu0 %1521 }
 0x324   : > { %3163 = vmatprep.mubr.msk.f32.mxu1 %vm586_vm0, %v1019_v38  ;;  %3216 = vmatprep.mubr.msk.f32.mxu0 %vm586_vm0, %v1522_v37  ;;  %v1276_v38 = vpop.permute.xlu1 %1275 }
 0x325   : > { %3217 = vmatmul.mubr.msk.f32.gmra.mxu0 %vm586_vm0, %v1524_v26 }
 0x327   : > { %3164 = vmatmul.mubr.msk.f32.gmra.mxu1 %vm586_vm0, %v1021_v22  ;;  %v1526_v34 = vpop.permute.xlu0 %1525 }
 0x328   : > { %3219 = vmatprep.mubr.msk.f32.mxu0 %vm586_vm0, %v1526_v34  ;;  %v1272_v49 = vpop.permute.xlu1 %1271 }
 0x329   : > { %3220 = vmatmul.mubr.msk.f32.gmra.mxu0 %vm586_vm0, %v1528_v20 }
 0x32b   : > { %v1286_v45 = vpop.permute.xlu0 %1285 }
 0x32c   : > { %3166 = vmatprep.subr.mxu1 %v1286_v45 }
 0x32d   : > { %3167 = vmatpush3.msra.mxu1 %v1286_v45 }
 0x32e   : > { %3168 = vmatprep.subr.mxu1 %v1284_v23 }
 0x32f   : > { %v1282_v19 = vpop.permute.xlu0 %1281  ;;  %3169 = vmatpush3.msra.mxu1 %v1284_v23 }
 0x330   : > { %3170 = vmatprep.subr.mxu1 %v1282_v19 }
 0x331   : > { %3171 = vmatpush3.msra.mxu1 %v1282_v19 }
 0x332   : > { %3172 = vmatprep.subr.mxu1 %v1280_v44 }
 0x333   : > { %3173 = vmatpush3.msra.mxu1 %v1280_v44  ;;  %v1274_v18 = vpop.permute.xlu0 %1273 }
 0x334   : > { %3174 = vmatprep.subr.mxu1 %v1278_v47 }
 0x335   : > { %3175 = vmatpush3.msra.mxu1 %v1278_v47 }
 0x336   : > { %3176 = vmatprep.subr.mxu1 %v1276_v38 }
 0x337   : > { %3177 = vmatpush3.msra.mxu1 %v1276_v38  ;;  %v4339_v50 = vpop.permute.xlu0 %1792 }
 0x338   : > { %3178 = vmatprep.subr.mxu1 %v1274_v18 }
 0x339   : > { %3179 = vmatpush3.msra.mxu1 %v1274_v18 }
 0x33a   : > { %3180 = vmatprep.subr.mxu1 %v1272_v49 }
 0x33b   : > { %3181 = vmatpush3.msra.mxu1 %v1272_v49 }
 0x33c   : > { %3222 = vmatprep.subr.mxu1 %v4339_v50 }
 0x39e   : > { %v4342_v52 = vpop.f32.mrf.mxu1 }
 0x39f   : > { %5000 = vst [vmem:[#allocation14_spill] sm:$0xff] %v4342_v52 }
 0x3a0   : > { %v4344_v53 = vpop.f32.mrf.mxu1 }
 0x3a1   : > { %5001 = vst [vmem:[#allocation15_spill] sm:$0xff] %v4344_v53 }
 0x3a2   : > { %v4346_v17 = vpop.f32.mrf.mxu1 }
 0x3a3   : > { %5002 = vst [vmem:[#allocation16_spill] sm:$0xff] %v4346_v17 }
 0x3a4   : > { %v4348_v51 = vpop.f32.mrf.mxu1 }
 0x3a5   : > { %5003 = vst [vmem:[#allocation17_spill] sm:$0xff] %v4348_v51 }
 0x3d3   : > { %v4350_v54 = vpop.f32.mrf.mxu1 }
 0x3d4   : > { %5004 = vst [vmem:[#allocation18_spill] sm:$0xff] %v4350_v54 }
 0x3d5   : > { %v4352_v29 = vpop.f32.mrf.mxu1 }
 0x3d6   : > { %5005 = vst [vmem:[#allocation19_spill] sm:$0xff] %v4352_v29 }
 0x3d7   : > { %v4354_v55 = vpop.f32.mrf.mxu1 }
 0x3d8   : > { %5006 = vst [vmem:[#allocation20_spill] sm:$0xff] %v4354_v55 }
 0x3d9   : > { %v4356_v26 = vpop.f32.mrf.mxu1 }
 0x3da   : > { %5007 = vst [vmem:[#allocation21_spill] sm:$0xff] %v4356_v26 }
 0x3db   : > { %v3156_v22 = vpop.f32.mrf.mxu1 }
 0x3dd   : > { %v1144_v40 = vpop.f32.mrf.mxu1  ;;  %v3212_v20 = vpop.f32.mrf.mxu0 }
 0x3de   : > { %v4361_v43 = vsel %vm555_vm1, %v3212_v20, -inf }
 0x3df   : > { %v1651_v23 = vpop.f32.mrf.mxu0  ;;  %v1701_v37 = vsel %vm748_vm2, %v4361_v43, -inf  ;;  %v3159_v44 = vpop.f32.mrf.mxu1 }
 0x3e0   : > { %v4368_v34 = vsel %vm554_vm3, %v1651_v23, -inf  ;;  %1702 = vmax.xlane.f32.xlu0 %v1701_v37 }
 0x3e1   : > { %v3215_v45 = vpop.f32.mrf.mxu0  ;;  %v1698_v47 = vsel %vm748_vm2, %v4368_v34, -inf  ;;  %v1154_v20 = vpop.f32.mrf.mxu1 }
 0x3e2   : > { %v4375_v19 = vsel %vm557_vm4, %v3215_v45, -inf  ;;  %1699 = vmax.xlane.f32.xlu1 %v1698_v47  ;;  %v4429_v53 = vsel %vm556_vm5, %v1154_v20, -inf }
 0x3e3   : > { %v1661_v38 = vpop.f32.mrf.mxu0  ;;  %v1707_v18 = vsel %vm748_vm2, %v4375_v19, -inf  ;;  %v3162_v29 = vpop.f32.mrf.mxu1 }
 0x3e4   : > { %v4382_v49 = vsel %vm556_vm5, %v1661_v38, -inf  ;;  %1708 = vmax.xlane.f32.xlu0 %v1707_v18  ;;  %v4396_v38 = vsel %vm554_vm3, %v1144_v40, -inf  ;;  %v4436_v17 = vsel %vm559_vm6, %v3162_v29, -inf }
 0x3e5   : > { %v3218_v23 = vpop.f32.mrf.mxu0  ;;  %v1704_v37 = vsel %vm748_vm2, %v4382_v49, -inf  ;;  %v1191_v40 = vsel %vm748_vm2, %v4396_v38, -inf }
 0x3e6   : > { %v4389_v45 = vsel %vm559_vm6, %v3218_v23, -inf  ;;  %1705 = vmax.xlane.f32.xlu1 %v1704_v37  ;;  %v4408_v37 = vsel %vm555_vm1, %v3156_v22, -inf }
 0x3e7   : > { %v1671_v47 = vpop.f32.mrf.mxu0  ;;  %v1713_v26 = vsel %vm748_vm2, %v4389_v45, -inf  ;;  %v1194_v54 = vsel %vm748_vm2, %v4408_v37, -inf }
 0x3e8   : > { %v4401_v18 = vsel %vm558_vm8, %v1671_v47, -inf  ;;  %1714 = vmax.xlane.f32.xlu0 %v1713_v26  ;;  %v4415_v47 = vsel %vm557_vm4, %v3159_v44, -inf  ;;  %v1164_v26 = vpop.f32.mrf.mxu1 }
 0x3e9   : > { %v3221_v55 = vpop.f32.mrf.mxu0  ;;  %v1710_v23 = vsel %vm748_vm2, %v4401_v18, -inf }
 0x3ea   : > { %1711 = vmax.xlane.f32.xlu1 %v1710_v23  ;;  %v1200_v23 = vsel %vm748_vm2, %v4415_v47, -inf  ;;  %v3165_v44 = vpop.f32.mrf.mxu1 }
 0x3eb   : > { %v1681_v51 = vpop.f32.mrf.mxu0  ;;  %v4450_v52 = vsel %vm561_vm7, %v3165_v44, -inf  ;;  %v4466_v44 = vsel %vm561_vm7, %v3221_v55, -inf }
 0x3ec   : > { %1192 = vmax.xlane.f32.xlu0 %v1191_v40  ;;  %v4422_v22 = vsel %vm560_vm9, %v1681_v51, -inf  ;;  %v1197_v51 = vsel %vm748_vm2, %v4429_v53, -inf  ;;  %v1174_v20 = vpop.f32.mrf.mxu1 }
 0x3ed   : > { %v1716_v40 = vsel %vm748_vm2, %v4422_v22, -inf }
 0x3ee   : > { %1195 = vmax.xlane.f32.xlu1 %v1194_v54  ;;  %v4443_v54 = vsel %vm558_vm8, %v1164_v26, -inf  ;;  %v1212_v26 = vsel %vm748_vm2, %v4450_v52, -inf }
 0x3ef   : > { %v1203_v29 = vsel %vm748_vm2, %v4443_v54, -inf }
 0x3f0   : > { %1201 = vmax.xlane.f32.xlu0 %v1200_v23  ;;  %v1206_v23 = vsel %vm748_vm2, %v4436_v17, -inf }
 0x3f2   : > { %1717 = vmax.xlane.f32.xlu1 %v1716_v40  ;;  %v4457_v40 = vsel %vm560_vm9, %v1174_v20, -inf }
 0x3f4   : > { %1198 = vmax.xlane.f32.xlu0 %v1197_v51  ;;  %v1209_v51 = vsel %vm748_vm2, %v4457_v40, -inf }
 0x3f6   : > { %1207 = vmax.xlane.f32.xlu1 %v1206_v23  ;;  %v1719_v23 = vsel %vm748_vm2, %v4466_v44, -inf }
 0x3f8   : > { %1204 = vmax.xlane.f32.xlu0 %v1203_v29 }
 0x3fa   : > { %1213 = vmax.xlane.f32.xlu1 %v1212_v26 }
 0x3fc   : > { %1210 = vmax.xlane.f32.xlu0 %v1209_v51 }
 0x400   : > { %1720 = vmax.xlane.f32.xlu0 %v1719_v23 }
 0x40b   : > { %2058 = vrot.lane.b32.xlu1 %v3979_v16, %s3715_s9 }
 0x40f   : > { %2056 = vrot.lane.b32.xlu1 %v3967_v13, %s3715_s9 }
 0x413   : > { %2052 = vrot.lane.b32.xlu1 %v3947_v5, %s3715_s9 }
 0x416   : > { %1778 = vrot.lane.b32.xlu0 %v3941_v2, %s3714_s23 }
 0x417   : > { %2048 = vrot.lane.b32.xlu1 %v3929_v62, %s3715_s9 }
 0x41a   : > { %2054 = vrot.lane.b32.xlu0 %v3957_v9, %s3715_s9 }
 0x41b   : > { %2044 = vrot.lane.b32.xlu1 %v3917_v58, %s3715_s9  ;;  %v1791_v58 = vpop.permute.xlu1 %1790 }
 0x41e   : > { %2050 = vrot.lane.b32.xlu0 %v3937_v1, %s3715_s9 }
 0x41f   : > { %2022 = vrot.lane.b32.xlu1 %v3921_v59, %s3715_s9 }
 0x422   : > { %2046 = vrot.lane.b32.xlu0 %v3923_v60, %s3715_s9  ;;  %v4520_v60 = vpop.permute.xlu1 %1784 }
 0x423   : > { %2026 = vrot.lane.b32.xlu1 %v3933_v63, %s3715_s9 }
 0x426   : > { %2020 = vrot.lane.b32.xlu0 %v3913_v57, %s3715_s9  ;;  %v4516_v57 = vpop.permute.xlu0 %1788  ;;  %v4524_v62 = vpop.permute.xlu1 %1780 }
 0x427   : > { %2030 = vrot.lane.b32.xlu1 %v3953_v7, %s3715_s9 }
 0x42a   : > { %2024 = vrot.lane.b32.xlu0 %v3927_v61, %s3715_s9  ;;  %v4518_v59 = vpop.permute.xlu0 %1786 }
 0x42b   : > { %2034 = vrot.lane.b32.xlu1 %v3975_v15, %s3715_s9 }
 0x42e   : > { %2028 = vrot.lane.b32.xlu0 %v3943_v3, %s3715_s9  ;;  %v4522_v61 = vpop.permute.xlu0 %1782 }
 0x42f   : > { %2297 = vrot.lane.b32.xlu1 %v3972_v14, %s3715_s9 }
 0x432   : > { %2032 = vrot.lane.b32.xlu0 %v3963_v11, %s3715_s9 }
 0x433   : > { %2295 = vrot.lane.b32.xlu1 %v3955_v8, %s3715_s9 }
 0x436   : > { %2299 = vrot.lane.b32.xlu0 %v3965_v12, %s3715_s9 }
 0x437   : > { %2293 = vrot.lane.b32.xlu1 %v3961_v10, %s3715_s9 }
 0x43a   : > { %2291 = vrot.lane.b32.xlu0 %v3945_v4, %s3715_s9 }
 0x43b   : > { %2289 = vrot.lane.b32.xlu1 %v3951_v6, %s3715_s9 }
 0x469   : > { %v1703_v63 = vpop.xlane.xlu0 %1702 }
 0x46b   : > { %v1700_v1 = vpop.xlane.xlu1 %1699 }
 0x46d   : > { %v1709_v3 = vpop.xlane.xlu0 %1708 }
 0x46f   : > { %v1706_v5 = vpop.xlane.xlu1 %1705 }
 0x471   : > { %v4526_v7 = vpop.xlane.xlu0 %1714 }
 0x473   : > { %v4528_v4 = vpop.xlane.xlu1 %1711 }
 0x475   : > { %v1193_v6 = vpop.xlane.xlu0 %1192 }
 0x476   : > { %v1215_v8 = vsub.f32 %v4396_v38, %v1193_v6 }
 0x477   : > { %v1196_v9 = vpop.xlane.xlu1 %1195 }
 0x478   : > { %v1223_v10 = vmul.f32 1.442695, %v1215_v8  ;;  %v1216_v11 = vsub.f32 %v4408_v37, %v1196_v9 }
 0x479   : > { %v1202_v12 = vpop.xlane.xlu0 %1201 }
 0x47a   : > { %3443 = vpow2.f32 %v1223_v10  ;;  %v1225_v13 = vmul.f32 1.442695, %v1216_v11  ;;  %v1218_v15 = vsub.f32 %v4415_v47, %v1202_v12  ;;  %v1722_v47 = vsub.f32 %v4368_v34, %v1700_v1 }
 0x47b   : > { %v4532_v14 = vpop.xlane.xlu1 %1717  ;;  %v1724_v34 = vsub.f32 %v4382_v49, %v1706_v5 }
 0x47c   : > { %3445 = vpow2.f32 %v1225_v13  ;;  %v1229_v29 = vmul.f32 1.442695, %v1218_v15 }
 0x47d   : > { %v1199_v16 = vpop.xlane.xlu0 %1198 }
 0x47e   : > { %v1217_v55 = vsub.f32 %v4429_v53, %v1199_v16  ;;  %v1734_v16 = vmul.f32 1.442695, %v1724_v34 }
 0x47f   : > { %v1208_v20 = vpop.xlane.xlu1 %1207 }
 0x480   : > { %v1227_v26 = vmul.f32 1.442695, %v1217_v55  ;;  %v1220_v38 = vsub.f32 %v4436_v17, %v1208_v20  ;;  %v1723_v17 = vsub.f32 %v4361_v43, %v1703_v63  ;;  %v1725_v63 = vsub.f32 %v4375_v19, %v1709_v3 }
 0x481   : > { %v1205_v51 = vpop.xlane.xlu0 %1204  ;;  %v1726_v55 = vsub.f32 %v4401_v18, %v4528_v4  ;;  %v1727_v19 = vsub.f32 %v4389_v45, %v4526_v7  ;;  %v1728_v3 = vsub.f32 %v4422_v22, %v4532_v14 }
 0x482   : > { %3447 = vpow2.f32 %v1227_v26  ;;  %v1219_v37 = vsub.f32 %v4443_v54, %v1205_v51  ;;  %v1233_v6 = vmul.f32 1.442695, %v1220_v38  ;;  %v1732_v43 = vmul.f32 1.442695, %v1723_v17 }
 0x483   : > { %v1214_v23 = vpop.xlane.xlu1 %1213  ;;  %3449 = vpow2.f32 %v1229_v29  ;;  %v1736_v20 = vmul.f32 1.442695, %v1725_v63  ;;  %v1740_v4 = vmul.f32 1.442695, %v1727_v19 }
 0x484   : > { %v1231_v8 = vmul.f32 1.442695, %v1219_v37  ;;  %v1222_v9 = vsub.f32 %v4450_v52, %v1214_v23  ;;  %v1730_v52 = vmul.f32 1.442695, %v1722_v47 }
 0x485   : > { %v1211_v10 = vpop.xlane.xlu0 %1210 }
 0x486   : > { %3451 = vpow2.f32 %v1231_v8  ;;  %v1221_v53 = vsub.f32 %v4457_v40, %v1211_v10  ;;  %v1237_v54 = vmul.f32 1.442695, %v1222_v9 }
 0x487   : > { %v4541_v11 = vpop.eup %3443  ;;  %v4543_v12 = vpop.permute.xlu1 %2058  ;;  %3453 = vpow2.f32 %v1233_v6 }
 0x488   : > { %v1235_v13 = vmul.f32 1.442695, %v1221_v53  ;;  %3182 = vmatprep.mubr.msk.f32.mxu1 %vm748_vm2, %v4541_v11  ;;  %v1239_v21 = vsel %vm748_vm2, %v4541_v11, 0.0 }
 0x489   : > { %v4548_v15 = vpop.eup %3445  ;;  %v1721_v1 = vpop.xlane.xlu0 %1720 }
 0x48a   : > { %3455 = vpow2.f32 %v1235_v13  ;;  %3183 = vmatmul.mubr.msk.f32.vlgmr.msra.gmra.mxu1 %vm748_vm2, %v4548_v15  ;;  %v1729_v29 = vsub.f32 %v4466_v44, %v1721_v1 }
 0x48b   : > { %3223 = vmatpush3.msra.mxu1 %v4339_v50  ;;  %v4554_v40 = vpop.permute.xlu1 %2056  ;;  %3457 = vpow2.f32 %v1237_v54 }
 0x48c   : > { %3224 = vmatprep.subr.mxu1 %v1791_v58  ;;  %3459 = vpow2.f32 %v1730_v52  ;;  %v1744_v26 = vmul.f32 1.442695, %v1729_v29 }
 0x48d   : > { %3225 = vmatpush3.msra.mxu1 %v1791_v58  ;;  %v1779_v49 = vpop.permute.xlu0 %1778  ;;  %3461 = vpow2.f32 %v1732_v43  ;;  %v1738_v58 = vmul.f32 1.442695, %v1726_v55 }
 0x48e   : > { %3226 = vmatprep.subr.mxu1 %v4516_v57  ;;  %3463 = vpow2.f32 %v1734_v16 }
 0x48f   : > { %v4560_v5 = vpop.eup %3447  ;;  %3227 = vmatpush3.msra.mxu1 %v4516_v57  ;;  %v4563_v50 = vpop.permute.xlu1 %2052  ;;  %3465 = vpow2.f32 %v1736_v20 }
 0x490   : > { %3228 = vmatprep.subr.mxu1 %v4518_v59  ;;  %3185 = vmatprep.mubr.msk.f32.mxu1 %vm748_vm2, %v4560_v5  ;;  %v4570_v18 = vpop.eup %3449  ;;  %3467 = vpow2.f32 %v1738_v58 }
 0x491   : > { %3229 = vmatpush3.msra.mxu1 %v4518_v59  ;;  %v2055_v57 = vpop.permute.xlu0 %2054  ;;  %v1742_v59 = vmul.f32 1.442695, %v1728_v3  ;;  %3469 = vpow2.f32 %v1740_v4  ;;  %v1248_v32 = vsel %vm748_vm2, %v4570_v18, 0.0 }
 0x492   : > { %3186 = vmatmul.mubr.msk.f32.gmra.mxu1 %vm748_vm2, %v4570_v18  ;;  %3230 = vmatprep.subr.mxu1 %v4520_v60  ;;  %v1245_v18 = vsel %vm748_vm2, %v4560_v5, 0.0 }
 0x493   : > { %v4578_v45 = vpop.eup %3451  ;;  %3231 = vmatpush3.msra.mxu1 %v4520_v60  ;;  %v4581_v7 = vpop.permute.xlu1 %2048  ;;  %3471 = vpow2.f32 %v1742_v59 }
 0x494   : > { %3232 = vmatprep.subr.mxu1 %v4522_v61  ;;  %3188 = vmatprep.mubr.msk.f32.mxu1 %vm748_vm2, %v4578_v45  ;;  %v4587_v22 = vpop.eup %3453  ;;  %3473 = vpow2.f32 %v1744_v26 }
 0x495   : > { %3233 = vmatpush3.msra.mxu1 %v4522_v61  ;;  %v2051_v14 = vpop.permute.xlu0 %2050 }
 0x496   : > { %3189 = vmatmul.mubr.msk.f32.gmra.mxu1 %vm748_vm2, %v4587_v22  ;;  %3234 = vmatprep.subr.mxu1 %v4524_v62 }
 0x497   : > { %v4593_v60 = vpop.eup %3455  ;;  %3235 = vmatpush3.msra.mxu1 %v4524_v62  ;;  %v4596_v44 = vpop.permute.xlu1 %2044 }
 0x498   : > { %3236 = vmatprep.subr.mxu1 %v1779_v49  ;;  %3191 = vmatprep.mubr.msk.f32.mxu1 %vm748_vm2, %v4593_v60  ;;  %v4600_v38 = vpop.eup %3457 }
 0x499   : > { %3237 = vmatpush3.msra.mxu1 %v1779_v49  ;;  %v2047_v61 = vpop.permute.xlu0 %2046  ;;  %v4602_v51 = vpop.eup %3459 }
 0x49a   : > { %3192 = vmatmul.mubr.msk.f32.gmra.mxu1 %vm748_vm2, %v4600_v38  ;;  %3250 = vmatprep.subr.msk.mxu1 %vm586_vm0, %v4543_v12  ;;  %v4610_v37 = vpop.eup %3461 }
 0x49b   : > { %3238 = vmatprep.mubr.msk.f32.mxu1 %vm748_vm2, %v4602_v51  ;;  %v2023_v62 = vpop.permute.xlu1 %2022  ;;  %v4612_v6 = vpop.eup %3463 }
 0x49c   : > { %v4622_v9 = vpop.eup %3465 }
 0x49d   : > { %v2021_v23 = vpop.permute.xlu0 %2020  ;;  %v4624_v10 = vpop.eup %3467 }
 0x49e   : > { %3239 = vmatmul.mubr.msk.f32.vlgmr.msra.gmra.mxu1 %vm748_vm2, %v4610_v37  ;;  %v1758_v5 = vsel %vm748_vm2, %v4624_v10, 0.0 }
 0x49f   : > { %3251 = vmatpush3.xpose.msk.msra.mxu1 %vm586_vm0, %v4543_v12  ;;  %3241 = vmatprep.mubr.msk.f32.mxu1 %vm748_vm2, %v4612_v6  ;;  %v2027_v8 = vpop.permute.xlu1 %2026  ;;  %v4633_v12 = vpop.eup %3469 }
 0x4a0   : > { %3252 = vmatprep.subr.msk.mxu1 %vm586_vm0, %v4554_v40  ;;  %v4635_v54 = vpop.eup %3471  ;;  %v1761_v11 = vsel %vm748_vm2, %v4633_v12, 0.0 }
 0x4a1   : > { %v2025_v47 = vpop.permute.xlu0 %2024  ;;  %v4644_v52 = vpop.eup %3473 }
 0x4a2   : > { %3242 = vmatmul.mubr.msk.f32.gmra.mxu1 %vm748_vm2, %v4622_v9 }
 0x4a3   : > { %3253 = vmatpush3.xpose.msk.msra.mxu1 %vm586_vm0, %v4554_v40  ;;  %3244 = vmatprep.mubr.msk.f32.mxu1 %vm748_vm2, %v4624_v10  ;;  %v2031_v53 = vpop.permute.xlu1 %2030 }
 0x4a4   : > { %3254 = vmatprep.subr.msk.mxu1 %vm586_vm0, %v2055_v57 }
 0x4a5   : > { %v2029_v17 = vpop.permute.xlu0 %2028 }
 0x4a6   : > { %3245 = vmatmul.mubr.msk.f32.gmra.mxu1 %vm748_vm2, %v4633_v12 }
 0x4a7   : > { %3255 = vmatpush3.xpose.msk.msra.mxu1 %vm586_vm0, %v2055_v57  ;;  %3247 = vmatprep.mubr.msk.f32.mxu1 %vm748_vm2, %v4635_v54  ;;  %v2035_v13 = vpop.permute.xlu1 %2034 }
 0x4a8   : > { %3256 = vmatprep.subr.msk.mxu1 %vm586_vm0, %v4563_v50 }
 0x4a9   : > { %v2033_v34 = vpop.permute.xlu0 %2032 }
 0x4aa   : > { %3248 = vmatmul.mubr.msk.f32.gmra.mxu1 %vm748_vm2, %v4644_v52 }
 0x4ab   : > { %3257 = vmatpush3.xpose.msk.msra.mxu1 %vm586_vm0, %v4563_v50  ;;  %3266 = vmatprep.mubr.msk.f32.mxu1 %vm586_vm0, %v2021_v23  ;;  %v2298_v1 = vpop.permute.xlu1 %2297 }
 0x4ac   : > { %3258 = vmatprep.subr.msk.mxu1 %vm586_vm0, %v2051_v14 }
 0x4ad   : > { %v2300_v40 = vpop.permute.xlu0 %2299 }
 0x4ae   : > { %3278 = vmatprep.subr.mxu0 %v2300_v40 }
 0x4af   : > { %3259 = vmatpush3.xpose.msk.msra.mxu1 %vm586_vm0, %v2051_v14  ;;  %v2296_v43 = vpop.permute.xlu1 %2295  ;;  %3279 = vmatpush3.msra.mxu0 %v2300_v40 }
 0x4b0   : > { %3260 = vmatprep.subr.msk.mxu1 %vm586_vm0, %v4581_v7  ;;  %3280 = vmatprep.subr.mxu0 %v2298_v1 }
 0x4b1   : > { %3281 = vmatpush3.msra.mxu0 %v2298_v1  ;;  %v2292_v16 = vpop.permute.xlu0 %2291 }
 0x4b2   : > { %3282 = vmatprep.subr.mxu0 %v2296_v43 }
 0x4b3   : > { %3261 = vmatpush3.xpose.msk.msra.mxu1 %vm586_vm0, %v4581_v7  ;;  %v2294_v63 = vpop.permute.xlu1 %2293  ;;  %3283 = vmatpush3.msra.mxu0 %v2296_v43 }
 0x4b4   : > { %3262 = vmatprep.subr.msk.mxu1 %vm586_vm0, %v2047_v61  ;;  %3284 = vmatprep.subr.mxu0 %v2294_v63 }
 0x4b5   : > { %3285 = vmatpush3.msra.mxu0 %v2294_v63 }
 0x4b6   : > { %3286 = vmatprep.subr.mxu0 %v2292_v16 }
 0x4b7   : > { %3263 = vmatpush3.xpose.msk.msra.mxu1 %vm586_vm0, %v2047_v61  ;;  %v2290_v55 = vpop.permute.xlu1 %2289  ;;  %3287 = vmatpush3.msra.mxu0 %v2292_v16 }
 0x4b8   : > { %3264 = vmatprep.subr.msk.mxu1 %vm586_vm0, %v4596_v44  ;;  %3288 = vmatprep.subr.mxu0 %v2290_v55 }
 0x4b9   : > { %3289 = vmatpush3.msra.mxu0 %v2290_v55 }
 0x4bb   : > { %3265 = vmatpush3.xpose.msk.msra.mxu1 %vm586_vm0, %v4596_v44 }
 0x4be   : > { %3267 = vmatmul.mubr.msk.f32.vlgmr.msra.gmra.mxu1 %vm586_vm0, %v2023_v62 }
 0x4bf   : > { %3269 = vmatprep.mubr.msk.f32.mxu1 %vm586_vm0, %v2025_v47 }
 0x4c2   : > { %3270 = vmatmul.mubr.msk.f32.gmra.mxu1 %vm586_vm0, %v2027_v8 }
 0x4c3   : > { %3272 = vmatprep.mubr.msk.f32.mxu1 %vm586_vm0, %v2029_v17 }
 0x4c6   : > { %3273 = vmatmul.mubr.msk.f32.gmra.mxu1 %vm586_vm0, %v2031_v53 }
 0x4c7   : > { %3275 = vmatprep.mubr.msk.f32.mxu1 %vm586_vm0, %v2033_v34 }
 0x4ca   : > { %3276 = vmatmul.mubr.msk.f32.gmra.mxu1 %vm586_vm0, %v2035_v13 }
 0x54a   : > { %v4670_v49 = vpop.f32.mrf.mxu1 }
 0x54c   : > { %v4672_v50 = vpop.f32.mrf.mxu1 }
 0x552   : > { %v4674_v20 = vpop.f32.mrf.mxu1 }
 0x554   : > { %v4676_v19 = vpop.f32.mrf.mxu1 }
 0x556   : > { %v4678_v58 = vpop.f32.mrf.mxu1 }
 0x558   : > { %v4680_v3 = vpop.f32.mrf.mxu1 }
 0x55a   : > { %v4682_v57 = vpop.f32.mrf.mxu1 }
 0x55c   : > { %v4684_v7 = vpop.f32.mrf.mxu1 }
 0x55e   : > { %v4686_v4 = vpop.f32.mrf.mxu1 }
 0x560   : > { %v4688_v29 = vpop.f32.mrf.mxu1 }
 0x562   : > { %v4690_v59 = vpop.f32.mrf.mxu1 }
 0x564   : > { %v4692_v14 = vpop.f32.mrf.mxu1 }
 0x566   : > { %v4694_v44 = vpop.f32.mrf.mxu1 }
 0x568   : > { %v4696_v26 = vpop.f32.mrf.mxu1 }
 0x56a   : > { %v4698_v61 = vpop.f32.mrf.mxu1 }
 0x56c   : > { %v4700_v62 = vpop.f32.mrf.mxu1 }
 0x57e   : > { %v3268_v23 = vpop.f32.mrf.mxu1 }
 0x57f   : > { %v4705_v8 = vsel %vm555_vm1, %v3268_v23, -inf }
 0x580   : > { %v2208_v47 = vsel %vm748_vm2, %v4705_v8, -inf  ;;  %v2158_v53 = vpop.f32.mrf.mxu1 }
 0x581   : > { %v4712_v17 = vsel %vm554_vm3, %v2158_v53, -inf  ;;  %2209 = vmax.xlane.f32.xlu1 %v2208_v47 }
 0x582   : > { %v3271_v13 = vpop.f32.mrf.mxu1  ;;  %v2205_v34 = vsel %vm748_vm2, %v4712_v17, -inf }
 0x583   : > { %v4719_v31 = vsel %vm557_vm4, %v3271_v13, -inf  ;;  %2206 = vmax.xlane.f32.xlu0 %v2205_v34  ;;  %v1242_v34 = vsel %vm748_vm2, %v4548_v15, 0.0  ;;  %v1749_v15 = vsel %vm748_vm2, %v4610_v37, 0.0  ;;  %v1767_v37 = vsel %vm748_vm2, %v4644_v52, 0.0 }
 0x584   : > { %v2168_v1 = vpop.f32.mrf.mxu1  ;;  %v2214_v43 = vsel %vm748_vm2, %v4719_v31, -inf }
 0x585   : > { %v4726_v30 = vsel %vm556_vm5, %v2168_v1, -inf  ;;  %v1755_v1 = vsel %vm748_vm2, %v4622_v9, 0.0  ;;  %v1251_v9 = vsel %vm748_vm2, %v4578_v45, 0.0 }
 0x586   : > { %v3274_v40 = vpop.f32.mrf.mxu1  ;;  %v2211_v23 = vsel %vm748_vm2, %v4726_v30, -inf }
 0x587   : > { %v4731_v63 = vsel %vm559_vm6, %v3274_v40, -inf  ;;  %2215 = vmax.xlane.f32.xlu0 %v2214_v43 }
 0x588   : > { %v2220_v33 = vsel %vm748_vm2, %v4731_v63, -inf  ;;  %v2178_v16 = vpop.f32.mrf.mxu1 }
 0x589   : > { %2221 = vmax.xlane.f32.xlu1 %v2220_v33  ;;  %v4740_v35 = vsel %vm558_vm8, %v2178_v16, -inf }
 0x58a   : > { %v3277_v55 = vpop.f32.mrf.mxu1  ;;  %v2217_v13 = vsel %vm748_vm2, %v4740_v35, -inf }
 0x58b   : > { %v4745_v41 = vsel %vm561_vm7, %v3277_v55, -inf  ;;  %2212 = vmax.xlane.f32.xlu0 %v2211_v23 }
 0x58c   : > { %v2226_v47 = vsel %vm748_vm2, %v4745_v41, -inf  ;;  %v2188_v53 = vpop.f32.mrf.mxu1 }
 0x58d   : > { %2227 = vmax.xlane.f32.xlu1 %v2226_v47  ;;  %v4754_v56 = vsel %vm560_vm9, %v2188_v53, -inf }
 0x58e   : > { %v2223_v48 = vsel %vm748_vm2, %v4754_v56, -inf }
 0x58f   : > { %2218 = vmax.xlane.f32.xlu0 %v2217_v13 }
 0x593   : > { %2224 = vmax.xlane.f32.xlu0 %v2223_v48 }
 0x59e   : > { %2285 = vrot.lane.b32.xlu1 %v3941_v2, %s3715_s9  ;;  %v1746_v2 = vsel %vm748_vm2, %v4602_v51, 0.0  ;;  %v1260_v51 = vsel %vm748_vm2, %v4600_v38, 0.0  ;;  %v1257_v38 = vsel %vm748_vm2, %v4593_v60, 0.0 }
 0x5a9   : > { %2287 = vrot.lane.b32.xlu0 %v3935_v0, %s3715_s9  ;;  %v1254_v0 = vsel %vm748_vm2, %v4587_v22, 0.0  ;;  %v1752_v22 = vsel %vm748_vm2, %v4612_v6, 0.0  ;;  %v1764_v6 = vsel %vm748_vm2, %v4635_v54, 0.0 }
 0x5c2   : > { %1243 = vadd.xlane.f32.xlu1 %v1242_v34 }
 0x5c6   : > { %1249 = vadd.xlane.f32.xlu1 %v1248_v32 }
 0x5c8   : > { %1240 = vadd.xlane.f32.xlu0 %v1239_v21 }
 0x5ca   : > { %1756 = vadd.xlane.f32.xlu1 %v1755_v1 }
 0x5cc   : > { %1747 = vadd.xlane.f32.xlu0 %v1746_v2 }
 0x5ce   : > { %1255 = vadd.xlane.f32.xlu1 %v1254_v0 }
 0x5d0   : > { %1750 = vadd.xlane.f32.xlu0 %v1749_v15 }
 0x5d2   : > { %1762 = vadd.xlane.f32.xlu1 %v1761_v11 }
 0x5d4   : > { %1246 = vadd.xlane.f32.xlu0 %v1245_v18 }
 0x5d6   : > { %1261 = vadd.xlane.f32.xlu1 %v1260_v51 }
 0x5d8   : > { %1753 = vadd.xlane.f32.xlu0 %v1752_v22 }
 0x5da   : > { %1768 = vadd.xlane.f32.xlu1 %v1767_v37 }
 0x5dc   : > { %1252 = vadd.xlane.f32.xlu0 %v1251_v9 }
 0x5e0   : > { %1759 = vadd.xlane.f32.xlu0 %v1758_v5 }
 0x5e4   : > { %1258 = vadd.xlane.f32.xlu0 %v1257_v38 }
 0x5e8   : > { %1765 = vadd.xlane.f32.xlu0 %v1764_v6 }
 0x60a   : > { %v2210_v12 = vpop.xlane.xlu1 %2209 }
 0x60b   : > { %v2230_v52 = vsub.f32 %v4705_v8, %v2210_v12 }
 0x60c   : > { %v2207_v40 = vpop.xlane.xlu0 %2206 }
 0x60d   : > { %v2239_v43 = vmul.f32 1.442695, %v2230_v52  ;;  %v2229_v45 = vsub.f32 %v4712_v17, %v2207_v40  ;;  %v800_v52 = vsel %vm748_vm2, %v4250_v28, 0.0  ;;  %v803_v28 = vsel %vm748_vm2, %v4258_v39, 0.0 }
 0x60f   : > { %3475 = vpow2.f32 %v2239_v43  ;;  %v2237_v33 = vmul.f32 1.442695, %v2229_v45  ;;  %v806_v43 = vsel %vm748_vm2, %v4262_v42, 0.0  ;;  %v797_v45 = vsel %vm748_vm2, %v4248_v27, 0.0 }
 0x610   : > { %v2216_v16 = vpop.xlane.xlu0 %2215  ;;  %v815_v27 = vsel %vm748_vm2, %v4311_v46, 0.0 }
 0x611   : > { %3477 = vpow2.f32 %v2237_v33  ;;  %v2232_v10 = vsub.f32 %v4719_v31, %v2216_v16  ;;  %v812_v33 = vsel %vm748_vm2, %v4304_v36, 0.0  ;;  %v818_v16 = vsel %vm748_vm2, %v4314_v25, 0.0 }
 0x612   : > { %v2222_v55 = vpop.xlane.xlu1 %2221 }
 0x613   : > { %v2243_v60 = vmul.f32 1.442695, %v2232_v10  ;;  %v2234_v23 = vsub.f32 %v4731_v63, %v2222_v55  ;;  %v809_v10 = vsel %vm748_vm2, %v4302_v24, 0.0 }
 0x614   : > { %v2213_v47 = vpop.xlane.xlu0 %2212 }
 0x615   : > { %3479 = vpow2.f32 %v2243_v60  ;;  %v2247_v54 = vmul.f32 1.442695, %v2234_v23  ;;  %v2231_v53 = vsub.f32 %v4726_v30, %v2213_v47 }
 0x616   : > { %v2228_v8 = vpop.xlane.xlu1 %2227 }
 0x617   : > { %3481 = vpow2.f32 %v2247_v54  ;;  %v2241_v13 = vmul.f32 1.442695, %v2231_v53  ;;  %v2236_v17 = vsub.f32 %v4745_v41, %v2228_v8 }
 0x618   : > { %v2219_v48 = vpop.xlane.xlu0 %2218 }
 0x619   : > { %3483 = vpow2.f32 %v2241_v13  ;;  %v2251_v34 = vmul.f32 1.442695, %v2236_v17  ;;  %v2233_v32 = vsub.f32 %v4740_v35, %v2219_v48 }
 0x61a   : > { %v2286_v11 = vpop.permute.xlu1 %2285 }
 0x61b   : > { %3485 = vpow2.f32 %v2251_v34  ;;  %v2245_v31 = vmul.f32 1.442695, %v2233_v32 }
 0x61c   : > { %v3476_v21 = vpop.eup %3475  ;;  %v2225_v1 = vpop.xlane.xlu0 %2224 }
 0x61d   : > { %3487 = vpow2.f32 %v2245_v31  ;;  %v2235_v63 = vsub.f32 %v4754_v56, %v2225_v1  ;;  %v2256_v2 = vsel %vm748_vm2, %v3476_v21, 0.0 }
 0x61e   : > { %v3478_v30 = vpop.eup %3477  ;;  %2257 = vadd.xlane.f32.xlu1 %v2256_v2 }
 0x61f   : > { %v2249_v0 = vmul.f32 1.442695, %v2235_v63  ;;  %3294 = vmatprep.mubr.msk.f32.mxu0 %vm748_vm2, %v3478_v30  ;;  %v2253_v41 = vsel %vm748_vm2, %v3478_v30, 0.0 }
 0x620   : > { %2254 = vadd.xlane.f32.xlu0 %v2253_v41  ;;  %v2288_v15 = vpop.permute.xlu0 %2287 }
 0x621   : > { %3489 = vpow2.f32 %v2249_v0  ;;  %3290 = vmatprep.subr.mxu0 %v2288_v15 }
 0x622   : > { %v3480_v35 = vpop.eup %3479  ;;  %3291 = vmatpush3.msra.mxu0 %v2288_v15 }
 0x623   : > { %3292 = vmatprep.subr.mxu0 %v2286_v11  ;;  %v2262_v18 = vsel %vm748_vm2, %v3480_v35, 0.0 }
 0x624   : > { %v3482_v56 = vpop.eup %3481  ;;  %2263 = vadd.xlane.f32.xlu1 %v2262_v18  ;;  %3293 = vmatpush3.msra.mxu0 %v2286_v11 }
 0x625   : > { %3295 = vmatmul.mubr.msk.f32.vlgmr.msra.gmra.mxu0 %vm748_vm2, %v3476_v21  ;;  %v2268_v22 = vsel %vm748_vm2, %v3482_v56, 0.0 }
 0x626   : > { %v3484_v51 = vpop.eup %3483 }
 0x627   : > { %3297 = vmatprep.mubr.msk.f32.mxu0 %vm748_vm2, %v3484_v51  ;;  %v2259_v37 = vsel %vm748_vm2, %v3484_v51, 0.0  ;;  %v2517_v51 = vld [vmem:[#allocation9 + $0x70] sm:$0xff] }
 0x628   : > { %v3486_v9 = vpop.eup %3485  ;;  %2269 = vadd.xlane.f32.xlu1 %v2268_v22  ;;  %2260 = vadd.xlane.f32.xlu0 %v2259_v37 }
 0x629   : > { %3298 = vmatmul.mubr.msk.f32.gmra.mxu0 %vm748_vm2, %v3480_v35  ;;  %v2274_v38 = vsel %vm748_vm2, %v3486_v9, 0.0 }
 0x62a   : > { %v3488_v5 = vpop.eup %3487 }
 0x62b   : > { %3300 = vmatprep.mubr.msk.f32.mxu0 %vm748_vm2, %v3488_v5  ;;  %v2265_v6 = vsel %vm748_vm2, %v3488_v5, 0.0  ;;  %v2516_v5 = vld [vmem:[#allocation9 + $0x68] sm:$0xff] }
 0x62c   : > { %2275 = vadd.xlane.f32.xlu1 %v2274_v38  ;;  %2266 = vadd.xlane.f32.xlu0 %v2265_v6  ;;  %v2515_v6 = vld [vmem:[#allocation9 + $0x60] sm:$0xff] }
 0x62d   : > { %3301 = vmatmul.mubr.msk.f32.gmra.mxu0 %vm748_vm2, %v3482_v56 }
 0x62e   : > { %v3490_v12 = vpop.eup %3489 }
 0x62f   : > { %3303 = vmatprep.mubr.msk.f32.mxu0 %vm748_vm2, %v3490_v12  ;;  %v2271_v40 = vsel %vm748_vm2, %v3490_v12, 0.0 }
 0x630   : > { %801 = vadd.xlane.f32.xlu1 %v800_v52  ;;  %2272 = vadd.xlane.f32.xlu0 %v2271_v40 }
 0x631   : > { %3304 = vmatmul.mubr.msk.f32.gmra.mxu0 %vm748_vm2, %v3486_v9 }
 0x634   : > { %807 = vadd.xlane.f32.xlu1 %v806_v43  ;;  %798 = vadd.xlane.f32.xlu0 %v797_v45  ;;  %v2511_v43 = vld [vmem:[#allocation9 + $0x40] sm:$0xff]  ;;  %v2510_v45 = vld [vmem:[#allocation9 + $0x38] sm:$0xff] }
 0x638   : > { %813 = vadd.xlane.f32.xlu1 %v812_v33  ;;  %804 = vadd.xlane.f32.xlu0 %v803_v28 }
 0x63c   : > { %819 = vadd.xlane.f32.xlu1 %v818_v16  ;;  %810 = vadd.xlane.f32.xlu0 %v809_v10 }
 0x640   : > { %816 = vadd.xlane.f32.xlu0 %v815_v27 }
 0x64b   : > { %v1244_v42 = vpop.xlane.xlu1 %1243 }
 0x64c   : > { %3491 = vrcp.f32 %v1244_v42 }
 0x64f   : > { %v1250_v36 = vpop.xlane.xlu1 %1249 }
 0x651   : > { %v1241_v55 = vpop.xlane.xlu0 %1240 }
 0x652   : > { %3493 = vrcp.f32 %v1241_v55 }
 0x653   : > { %v1757_v39 = vpop.xlane.xlu1 %1756 }
 0x655   : > { %v1748_v60 = vpop.xlane.xlu0 %1747 }
 0x656   : > { %3495 = vrcp.f32 %v1748_v60 }
 0x657   : > { %v1256_v24 = vpop.xlane.xlu1 %1255 }
 0x659   : > { %v3492_v23 = vpop.eup %3491  ;;  %v1751_v47 = vpop.xlane.xlu0 %1750 }
 0x65a   : > { %3497 = vrcp.f32 %v1751_v47  ;;  %v1433_v25 = vmul.f32 %v3492_v23, %v4670_v49 }
 0x65b   : > { %3499 = vrcp.f32 %v1250_v36  ;;  %v1763_v8 = vpop.xlane.xlu1 %1762 }
 0x65c   : > { %1450 = vrot.lane.b32.xlu1 %v1433_v25, %s3715_s9 }
 0x65d   : > { %v1247_v54 = vpop.xlane.xlu0 %1246 }
 0x65e   : > { %3501 = vrcp.f32 %v1247_v54 }
 0x65f   : > { %v3494_v46 = vpop.eup %3493  ;;  %3503 = vrcp.f32 %v1757_v39  ;;  %v1262_v32 = vpop.xlane.xlu1 %1261 }
 0x660   : > { %v1432_v53 = vmul.f32 %v3494_v46, %v4672_v50 }
 0x661   : > { %v1754_v13 = vpop.xlane.xlu0 %1753 }
 0x662   : > { %3505 = vrcp.f32 %v1754_v13  ;;  %1448 = vrot.lane.b32.xlu0 %v1432_v53, %s3715_s9  ;;  %v5008_v53 = vld [vmem:[#allocation14_spill] sm:$0xff] }
 0x663   : > { %v3496_v17 = vpop.eup %3495  ;;  %3507 = vrcp.f32 %v1256_v24  ;;  %v1769_v30 = vpop.xlane.xlu1 %1768 }
 0x664   : > { %v1939_v48 = vmul.f32 %v3496_v17, %v4688_v29 }
 0x665   : > { %v1253_v49 = vpop.xlane.xlu0 %1252 }
 0x666   : > { %3509 = vrcp.f32 %v1253_v49  ;;  %1955 = vrot.lane.b32.xlu1 %v1939_v48, %s3714_s23  ;;  %v5009_v49 = vld [vmem:[#allocation16_spill] sm:$0xff] }
 0x667   : > { %v3498_v34 = vpop.eup %3497  ;;  %3511 = vrcp.f32 %v1763_v8 }
 0x668   : > { %v1940_v31 = vmul.f32 %v3498_v34, %v4686_v4  ;;  %v3500_v21 = vpop.eup %3499 }
 0x669   : > { %v1760_v50 = vpop.xlane.xlu0 %1759  ;;  %v1435_v63 = vmul.f32 %v3500_v21, %v4674_v20 }
 0x66a   : > { %3513 = vrcp.f32 %v1760_v50  ;;  %1957 = vrot.lane.b32.xlu1 %v1940_v31, %s3714_s23 }
 0x66b   : > { %v3502_v1 = vpop.eup %3501  ;;  %3515 = vrcp.f32 %v1262_v32  ;;  %v5010_v32 = vld [vmem:[#allocation15_spill] sm:$0xff] }
 0x66c   : > { %v1434_v29 = vmul.f32 %v3502_v1, %v4676_v19  ;;  %v3504_v2 = vpop.eup %3503 }
 0x66d   : > { %v1259_v0 = vpop.xlane.xlu0 %1258  ;;  %v1942_v41 = vmul.f32 %v3504_v2, %v4690_v59  ;;  %v2518_v59 = vld [vmem:[#allocation9 + $0x78] sm:$0xff] }
 0x66e   : > { %3517 = vrcp.f32 %v1259_v0  ;;  %1454 = vrot.lane.b32.xlu1 %v1435_v63, %s3715_s9  ;;  %1452 = vrot.lane.b32.xlu0 %v1434_v29, %s3715_s9  ;;  %v5011_v63 = vld [vmem:[#allocation18_spill] sm:$0xff]  ;;  %v5012_v2 = vld [vmem:[#allocation17_spill] sm:$0xff] }
 0x66f   : > { %v3506_v4 = vpop.eup %3505  ;;  %3519 = vrcp.f32 %v1769_v30  ;;  %3306 = vmatprep.subr.mxu0 %v2518_v59 }
 0x670   : > { %v1941_v15 = vmul.f32 %v3506_v4, %v4692_v14  ;;  %v3508_v35 = vpop.eup %3507  ;;  %3307 = vmatpush3.msra.mxu0 %v2518_v59 }
 0x671   : > { %v1766_v11 = vpop.xlane.xlu0 %1765  ;;  %v1437_v19 = vmul.f32 %v3508_v35, %v4678_v58  ;;  %3308 = vmatprep.subr.mxu0 %v2517_v51 }
 0x672   : > { %3521 = vrcp.f32 %v1766_v11  ;;  %1961 = vrot.lane.b32.xlu1 %v1942_v41, %s3714_s23  ;;  %1959 = vrot.lane.b32.xlu0 %v1941_v15, %s3714_s23  ;;  %v5013_v15 = vld [vmem:[#allocation20_spill] sm:$0xff]  ;;  %v5014_v11 = vld [vmem:[#allocation19_spill] sm:$0xff] }
 0x673   : > { %v3510_v20 = vpop.eup %3509  ;;  %3309 = vmatpush3.msra.mxu0 %v2517_v51  ;;  %v2507_v51 = vld [vmem:[#allocation9 + $0x20] sm:$0xff] }
 0x674   : > { %v1436_v18 = vmul.f32 %v3510_v20, %v4680_v3  ;;  %v3512_v56 = vpop.eup %3511  ;;  %3310 = vmatprep.subr.mxu0 %v2516_v5 }
 0x675   : > { %v1944_v22 = vmul.f32 %v3512_v56, %v4694_v44  ;;  %3311 = vmatpush3.msra.mxu0 %v2516_v5  ;;  %v2514_v44 = vld [vmem:[#allocation9 + $0x58] sm:$0xff] }
 0x676   : > { %1458 = vrot.lane.b32.xlu1 %v1437_v19, %s3715_s9  ;;  %1456 = vrot.lane.b32.xlu0 %v1436_v18, %s3715_s9  ;;  %v5015_v56 = vld [vmem:[#allocation21_spill] sm:$0xff] }
 0x677   : > { %v3514_v14 = vpop.eup %3513  ;;  %3312 = vmatprep.subr.mxu0 %v2515_v6 }
 0x678   : > { %v1943_v37 = vmul.f32 %v3514_v14, %v4696_v26  ;;  %v3516_v9 = vpop.eup %3515  ;;  %3313 = vmatpush3.msra.mxu0 %v2515_v6 }
 0x679   : > { %v1439_v3 = vmul.f32 %v3516_v9, %v4682_v57  ;;  %3314 = vmatprep.subr.mxu0 %v2514_v44  ;;  %v2513_v57 = vld [vmem:[#allocation9 + $0x50] sm:$0xff] }
 0x67a   : > { %1965 = vrot.lane.b32.xlu1 %v1944_v22, %s3714_s23  ;;  %1963 = vrot.lane.b32.xlu0 %v1943_v37, %s3714_s23  ;;  %v2506_v22 = vld [vmem:[#allocation9 + $0x18] sm:$0xff]  ;;  %v2505_v37 = vld [vmem:[#allocation9 + $0x10] sm:$0xff] }
 0x67b   : > { %v3518_v58 = vpop.eup %3517  ;;  %3315 = vmatpush3.msra.mxu0 %v2514_v44 }
 0x67c   : > { %v1438_v38 = vmul.f32 %v3518_v58, %v4684_v7  ;;  %v3520_v12 = vpop.eup %3519  ;;  %v2512_v7 = vld [vmem:[#allocation9 + $0x48] sm:$0xff]  ;;  %3316 = vmatprep.subr.mxu0 %v2513_v57 }
 0x67d   : > { %v1946_v52 = vmul.f32 %v3520_v12, %v4698_v61  ;;  %3317 = vmatpush3.msra.mxu0 %v2513_v57  ;;  %v2509_v61 = vld [vmem:[#allocation9 + $0x30] sm:$0xff]  ;;  %v2504_v58 = vld [vmem:[#allocation9 + $0x8] sm:$0xff] }
 0x67e   : > { %1462 = vrot.lane.b32.xlu1 %v1439_v3, %s3715_s9  ;;  %1460 = vrot.lane.b32.xlu0 %v1438_v38, %s3715_s9  ;;  %v2503_v3 = vld [vmem:[#allocation9] sm:$0xff] }
 0x67f   : > { %v3522_v26 = vpop.eup %3521  ;;  %3318 = vmatprep.subr.mxu0 %v2512_v7 }
 0x680   : > { %v1945_v40 = vmul.f32 %v3522_v26, %v4700_v62  ;;  %3319 = vmatpush3.msra.mxu0 %v2512_v7  ;;  %v2508_v62 = vld [vmem:[#allocation9 + $0x28] sm:$0xff] }
 0x681   : > { %3320 = vmatprep.subr.mxu0 %v2511_v43 }
 0x682   : > { %1969 = vrot.lane.b32.xlu1 %v1946_v52, %s3714_s23  ;;  %1967 = vrot.lane.b32.xlu0 %v1945_v40, %s3714_s23 }
 0x683   : > { %3321 = vmatpush3.msra.mxu0 %v2511_v43 }
 0x684   : > { %3322 = vmatprep.subr.mxu0 %v2510_v45 }
 0x685   : > { %3323 = vmatpush3.msra.mxu0 %v2510_v45 }
 0x686   : > { %3324 = vmatprep.subr.mxu0 %v2509_v61 }
 0x687   : > { %3325 = vmatpush3.msra.mxu0 %v2509_v61 }
 0x688   : > { %3326 = vmatprep.subr.mxu0 %v2508_v62 }
 0x689   : > { %3327 = vmatpush3.msra.mxu0 %v2508_v62 }
 0x68a   : > { %3328 = vmatprep.subr.mxu0 %v2507_v51 }
 0x68b   : > { %3329 = vmatpush3.msra.mxu0 %v2507_v51 }
 0x68c   : > { %3330 = vmatprep.subr.mxu0 %v2506_v22 }
 0x68d   : > { %3331 = vmatpush3.msra.mxu0 %v2506_v22 }
 0x68e   : > { %3332 = vmatprep.subr.mxu0 %v2505_v37 }
 0x68f   : > { %3333 = vmatpush3.msra.mxu0 %v2505_v37 }
 0x690   : > { %3334 = vmatprep.subr.mxu0 %v2504_v58 }
 0x691   : > { %3335 = vmatpush3.msra.mxu0 %v2504_v58 }
 0x692   : > { %3336 = vmatprep.subr.mxu0 %v2503_v3 }
 0x693   : > { %3337 = vmatpush3.msra.mxu0 %v2503_v3 }
 0x6a7   : > { %v2258_v33 = vpop.xlane.xlu1 %2257 }
 0x6a9   : > { %v2255_v28 = vpop.xlane.xlu0 %2254 }
 0x6ad   : > { %v2264_v16 = vpop.xlane.xlu1 %2263 }
 0x6b1   : > { %v4866_v10 = vpop.xlane.xlu1 %2269  ;;  %v2261_v27 = vpop.xlane.xlu0 %2260 }
 0x6b5   : > { %v4868_v42 = vpop.xlane.xlu1 %2275  ;;  %v4870_v36 = vpop.xlane.xlu0 %2266 }
 0x6b9   : > { %v802_v55 = vpop.xlane.xlu1 %801  ;;  %v4872_v39 = vpop.xlane.xlu0 %2272 }
 0x6ba   : > { %3523 = vrcp.f32 %v802_v55 }
 0x6bd   : > { %v808_v60 = vpop.xlane.xlu1 %807  ;;  %v799_v23 = vpop.xlane.xlu0 %798 }
 0x6be   : > { %3525 = vrcp.f32 %v808_v60 }
 0x6bf   : > { %3527 = vrcp.f32 %v799_v23 }
 0x6c1   : > { %v814_v47 = vpop.xlane.xlu1 %813  ;;  %v805_v25 = vpop.xlane.xlu0 %804 }
 0x6c2   : > { %3529 = vrcp.f32 %v814_v47 }
 0x6c3   : > { %3531 = vrcp.f32 %v805_v25 }
 0x6c5   : > { %v820_v24 = vpop.xlane.xlu1 %819  ;;  %v811_v54 = vpop.xlane.xlu0 %810 }
 0x6c6   : > { %3533 = vrcp.f32 %v820_v24 }
 0x6c7   : > { %v3524_v46 = vpop.eup %3523  ;;  %3535 = vrcp.f32 %v811_v54 }
 0x6c8   : > { %v959_v8 = vmul.f32 %v3524_v46, %v5008_v53 }
 0x6c9   : > { %v817_v13 = vpop.xlane.xlu0 %816 }
 0x6ca   : > { %3537 = vrcp.f32 %v817_v13  ;;  %967 = vst.msk [vmem:[#allocation3 + $0x8] sm:$0xff] %vm586_vm0, %v959_v8 }
 0x6cb   : > { %v3526_v17 = vpop.eup %3525  ;;  %3539 = vrcp.f32 %v2258_v33 }
 0x6cc   : > { %v3528_v48 = vpop.eup %3527  ;;  %v961_v34 = vmul.f32 %v3526_v17, %v5009_v49  ;;  %3541 = vrcp.f32 %v2255_v28 }
 0x6cd   : > { %v958_v31 = vmul.f32 %v3528_v48, %v5010_v32  ;;  %3543 = vrcp.f32 %v2264_v16 }
 0x6ce   : > { %v1451_v21 = vpop.permute.xlu1 %1450  ;;  %969 = vst.msk [vmem:[#allocation3 + $0x18] sm:$0xff] %vm586_vm0, %v961_v34  ;;  %3545 = vrcp.f32 %v2261_v27 }
 0x6cf   : > { %v3530_v50 = vpop.eup %3529  ;;  %1474 = vst.msk [vmem:[#allocation3 + $0x8] sm:$0xff] %vm1472_vm10, %v1451_v21  ;;  %3547 = vrcp.f32 %v4866_v10 }
 0x6d0   : > { %966 = vst.msk [vmem:[#allocation3] sm:$0xff] %vm586_vm0, %v958_v31  ;;  %v3532_v1 = vpop.eup %3531  ;;  %v963_v29 = vmul.f32 %v3530_v50, %v5011_v63  ;;  %3549 = vrcp.f32 %v4870_v36 }
 0x6d1   : > { %v960_v30 = vmul.f32 %v3532_v1, %v5012_v2  ;;  %3551 = vrcp.f32 %v4868_v42 }
 0x6d2   : > { %971 = vst.msk [vmem:[#allocation3 + $0x28] sm:$0xff] %vm586_vm0, %v963_v29  ;;  %3553 = vrcp.f32 %v4872_v39 }
 0x6d3   : > { %v3534_v0 = vpop.eup %3533  ;;  %968 = vst.msk [vmem:[#allocation3 + $0x10] sm:$0xff] %vm586_vm0, %v960_v30 }
 0x6d4   : > { %v3536_v4 = vpop.eup %3535  ;;  %v1449_v41 = vpop.permute.xlu0 %1448  ;;  %v965_v35 = vmul.f32 %v3534_v0, %v5013_v15 }
 0x6d5   : > { %1473 = vst.msk [vmem:[#allocation3] sm:$0xff] %vm1472_vm10, %v1449_v41  ;;  %v962_v20 = vmul.f32 %v3536_v4, %v5014_v11  ;;  %v2854_v11 = vld [vmem:[%s4983_s3] ss:$0 sm:$0xff] }
 0x6d6   : > { %973 = vst.msk [vmem:[#allocation3 + $0x38] sm:$0xff] %vm586_vm0, %v965_v35 }
 0x6d7   : > { %v3538_v19 = vpop.eup %3537  ;;  %970 = vst.msk [vmem:[#allocation3 + $0x20] sm:$0xff] %vm586_vm0, %v962_v20 }
 0x6d8   : > { %v1956_v18 = vpop.permute.xlu1 %1955  ;;  %v964_v59 = vmul.f32 %v3538_v19, %v5015_v56  ;;  %v3540_v12 = vpop.eup %3539 }
 0x6d9   : > { %1980 = vst.msk [vmem:[#allocation3] sm:$0xff] %vm1979_vm11, %v1956_v18  ;;  %v3542_v52 = vpop.eup %3541 }
 0x6da   : > { %972 = vst.msk [vmem:[#allocation3 + $0x30] sm:$0xff] %vm586_vm0, %v964_v59  ;;  %v3544_v45 = vpop.eup %3543 }
 0x6db   : > { %v3546_v33 = vpop.eup %3545 }
 0x6dc   : > { %v1958_v14 = vpop.permute.xlu1 %1957  ;;  %v3548_v42 = vpop.eup %3547 }
 0x6dd   : > { %1981 = vst.msk [vmem:[#allocation3 + $0x8] sm:$0xff] %vm1979_vm11, %v1958_v14  ;;  %v3550_v39 = vpop.eup %3549 }
 0x6de   : > { %v3552_v24 = vpop.eup %3551 }
 0x6df   : > { %v3554_v53 = vpop.eup %3553 }
 0x6e0   : > { %v1455_v9 = vpop.permute.xlu1 %1454  ;;  %v1453_v5 = vpop.permute.xlu0 %1452 }
 0x6e1   : > { %1476 = vst.msk [vmem:[#allocation3 + $0x18] sm:$0xff] %vm1472_vm10, %v1455_v9  ;;  %1475 = vst.msk [vmem:[#allocation3 + $0x10] sm:$0xff] %vm1472_vm10, %v1453_v5 }
 0x6e4   : > { %v1962_v38 = vpop.permute.xlu1 %1961  ;;  %v1960_v6 = vpop.permute.xlu0 %1959 }
 0x6e5   : > { %1983 = vst.msk [vmem:[#allocation3 + $0x18] sm:$0xff] %vm1979_vm11, %v1962_v38  ;;  %1982 = vst.msk [vmem:[#allocation3 + $0x10] sm:$0xff] %vm1979_vm11, %v1960_v6  ;;  %v3296_v44 = vpop.f32.mrf.mxu0 }
 0x6e6   : > { %v2447_v26 = vmul.f32 %v3540_v12, %v3296_v44 }
 0x6e7   : > { %v2399_v40 = vpop.f32.mrf.mxu0 }
 0x6e8   : > { %v2446_v57 = vmul.f32 %v3542_v52, %v2399_v40  ;;  %2464 = vrot.lane.b32.xlu1 %v2447_v26, %s3713_s21  ;;  %v1459_v7 = vpop.permute.xlu1 %1458  ;;  %v1457_v43 = vpop.permute.xlu0 %1456 }
 0x6e9   : > { %1478 = vst.msk [vmem:[#allocation3 + $0x28] sm:$0xff] %vm1472_vm10, %v1459_v7  ;;  %1477 = vst.msk [vmem:[#allocation3 + $0x20] sm:$0xff] %vm1472_vm10, %v1457_v43  ;;  %v3299_v61 = vpop.f32.mrf.mxu0 }
 0x6ea   : > { %v2449_v62 = vmul.f32 %v3544_v45, %v3299_v61  ;;  %2462 = vrot.lane.b32.xlu0 %v2446_v57, %s3713_s21 }
 0x6eb   : > { %v2409_v28 = vpop.f32.mrf.mxu0 }
 0x6ec   : > { %v2448_v16 = vmul.f32 %v3546_v33, %v2409_v28  ;;  %2468 = vrot.lane.b32.xlu1 %v2449_v62, %s3713_s21  ;;  %v1966_v10 = vpop.permute.xlu1 %1965  ;;  %v1964_v27 = vpop.permute.xlu0 %1963 }
 0x6ed   : > { %1985 = vst.msk [vmem:[#allocation3 + $0x28] sm:$0xff] %vm1979_vm11, %v1966_v10  ;;  %1984 = vst.msk [vmem:[#allocation3 + $0x20] sm:$0xff] %vm1979_vm11, %v1964_v27  ;;  %v3302_v36 = vpop.f32.mrf.mxu0 }
 0x6ee   : > { %v2451_v55 = vmul.f32 %v3548_v42, %v3302_v36  ;;  %2466 = vrot.lane.b32.xlu0 %v2448_v16, %s3713_s21 }
 0x6ef   : > { %v2419_v60 = vpop.f32.mrf.mxu0 }
 0x6f0   : > { %v2450_v23 = vmul.f32 %v3550_v39, %v2419_v60  ;;  %2472 = vrot.lane.b32.xlu1 %v2451_v55, %s3713_s21  ;;  %v1463_v47 = vpop.permute.xlu1 %1462  ;;  %v1461_v25 = vpop.permute.xlu0 %1460 }
 0x6f1   : > { %1480 = vst.msk [vmem:[#allocation3 + $0x38] sm:$0xff] %vm1472_vm10, %v1463_v47  ;;  %1479 = vst.msk [vmem:[#allocation3 + $0x30] sm:$0xff] %vm1472_vm10, %v1461_v25  ;;  %v3305_v54 = vpop.f32.mrf.mxu0 }
 0x6f2   : > { %v2453_v46 = vmul.f32 %v3552_v24, %v3305_v54  ;;  %2470 = vrot.lane.b32.xlu0 %v2450_v23, %s3713_s21 }
 0x6f3   : > { %v2429_v8 = vpop.f32.mrf.mxu0 }
 0x6f4   : > { %v2452_v13 = vmul.f32 %v3554_v53, %v2429_v8  ;;  %2476 = vrot.lane.b32.xlu1 %v2453_v46, %s3713_s21  ;;  %v1970_v17 = vpop.permute.xlu1 %1969  ;;  %v1968_v48 = vpop.permute.xlu0 %1967 }
 0x6f5   : > { %1987 = vst.msk [vmem:[#allocation3 + $0x38] sm:$0xff] %vm1979_vm11, %v1970_v17  ;;  %1986 = vst.msk [vmem:[#allocation3 + $0x30] sm:$0xff] %vm1979_vm11, %v1968_v48 }
 0x6f6   : > { %2474 = vrot.lane.b32.xlu0 %v2452_v13, %s3713_s21 }
 0x75a   : > { %v2465_v49 = vpop.permute.xlu1 %2464 }
 0x75b   : > { %2488 = vst.msk [vmem:[#allocation3 + $0x8] sm:$0xff] %vm2486_vm12, %v2465_v49 }
 0x75c   : > { %v2463_v34 = vpop.permute.xlu0 %2462 }
 0x75d   : > { %2487 = vst.msk [vmem:[#allocation3] sm:$0xff] %vm2486_vm12, %v2463_v34 }
 0x75e   : > { %v2469_v32 = vpop.permute.xlu1 %2468 }
 0x75f   : > { %2490 = vst.msk [vmem:[#allocation3 + $0x18] sm:$0xff] %vm2486_vm12, %v2469_v32 }
 0x760   : > { %v2467_v31 = vpop.permute.xlu0 %2466 }
 0x761   : > { %2489 = vst.msk [vmem:[#allocation3 + $0x10] sm:$0xff] %vm2486_vm12, %v2467_v31 }
 0x762   : > { %v2473_v21 = vpop.permute.xlu1 %2472  ;;  %v2496_v63 = vld [vmem:[#allocation3 + $0x8] sm:$0xff] }
 0x763   : > { %2492 = vst.msk [vmem:[#allocation3 + $0x28] sm:$0xff] %vm2486_vm12, %v2473_v21 }
 0x764   : > { %v2471_v50 = vpop.permute.xlu0 %2470  ;;  %v2495_v1 = vld [vmem:[#allocation3] sm:$0xff] }
 0x765   : > { %2491 = vst.msk [vmem:[#allocation3 + $0x20] sm:$0xff] %vm2486_vm12, %v2471_v50  ;;  %3338 = vmatprep.mubr.f32.mxu0 %v2495_v1 }
 0x766   : > { %v2477_v29 = vpop.permute.xlu1 %2476  ;;  %3339 = vmatmul.mubr.f32.vlgmr.msra.gmra.mxu0 %v2496_v63  ;;  %v2498_v0 = vld [vmem:[#allocation3 + $0x18] sm:$0xff] }
 0x767   : > { %2494 = vst.msk [vmem:[#allocation3 + $0x38] sm:$0xff] %vm2486_vm12, %v2477_v29 }
 0x768   : > { %v2475_v2 = vpop.permute.xlu0 %2474  ;;  %v2497_v30 = vld [vmem:[#allocation3 + $0x10] sm:$0xff] }
 0x769   : > { %2493 = vst.msk [vmem:[#allocation3 + $0x30] sm:$0xff] %vm2486_vm12, %v2475_v2  ;;  %3341 = vmatprep.mubr.f32.mxu0 %v2497_v30 }
 0x76a   : > { %3342 = vmatmul.mubr.f32.gmra.mxu0 %v2498_v0  ;;  %v2500_v41 = vld [vmem:[#allocation3 + $0x28] sm:$0xff] }
 0x76c   : > { %v2499_v4 = vld [vmem:[#allocation3 + $0x20] sm:$0xff] }
 0x76d   : > { %3344 = vmatprep.mubr.f32.mxu0 %v2499_v4 }
 0x76e   : > { %3345 = vmatmul.mubr.f32.gmra.mxu0 %v2500_v41  ;;  %v2502_v35 = vld [vmem:[#allocation3 + $0x38] sm:$0xff] }
 0x770   : > { %v2501_v15 = vld [vmem:[#allocation3 + $0x30] sm:$0xff] }
 0x771   : > { %3347 = vmatprep.mubr.f32.mxu0 %v2501_v15 }
 0x772   : > { %3348 = vmatmul.mubr.f32.gmra.mxu0 %v2502_v35 }
 0x826   : > { %v3340_v20 = vpop.f32.mrf.mxu0 }
 0x827   : > { %v2598_v19 = vadd.f32 %v3340_v20, %v2854_v11 }
 0x828   : > { %v2592_v18 = vpop.f32.mrf.mxu0 }
 0x829   : > { %2632 = vst [vmem:[%s244_s7 + $0x8] sm:$0xff] %v2598_v19  ;;  %v2593_v56 = vadd.f32 %v2854_v11, %v2592_v18 }
 0x82a   : > { %v3343_v59 = vpop.f32.mrf.mxu0 }
 0x82b   : > { %2631 = vst [vmem:[%s244_s7] sm:$0xff] %v2593_v56  ;;  %v2608_v51 = vadd.f32 %v3343_v59, %v2854_v11 }
 0x82c   : > { %v2602_v14 = vpop.f32.mrf.mxu0 }
 0x82d   : > { %2634 = vst [vmem:[%s244_s7 + $0x18] sm:$0xff] %v2608_v51  ;;  %v2603_v22 = vadd.f32 %v2854_v11, %v2602_v14 }
 0x82e   : > { %v3346_v37 = vpop.f32.mrf.mxu0 }
 0x82f   : > { %2633 = vst [vmem:[%s244_s7 + $0x10] sm:$0xff] %v2603_v22  ;;  %v2618_v9 = vadd.f32 %v3346_v37, %v2854_v11 }
 0x830   : > { %v2612_v5 = vpop.f32.mrf.mxu0 }
 0x831   : > { %2636 = vst [vmem:[%s244_s7 + $0x28] sm:$0xff] %v2618_v9  ;;  %v2613_v58 = vadd.f32 %v2854_v11, %v2612_v5 }
 0x832   : > { %v3349_v3 = vpop.f32.mrf.mxu0 }
 0x833   : > { %2635 = vst [vmem:[%s244_s7 + $0x20] sm:$0xff] %v2613_v58  ;;  %v2628_v38 = vadd.f32 %v3349_v3, %v2854_v11 }
 0x834   : > { %v2622_v6 = vpop.f32.mrf.mxu0 }
 0x835   : > { %2638 = vst [vmem:[%s244_s7 + $0x38] sm:$0xff] %v2628_v38  ;;  %v2623_v12 = vadd.f32 %v2854_v11, %v2622_v6 }
 0x837   : > { %2637 = vst [vmem:[%s244_s7 + $0x30] sm:$0xff] %v2623_v12 }
 0x838   : > { %3648 = shalt.err (!%p3645_p9)
}
 0x839   : > { %s3649_s8 = scalar_lea.hbm %s4937_s30, 1024  ;;  %s3653_s9 = scalar_lea.hbm %s4984_s4, 2048 }
 0x83a   : > { %p3650_p13 = scmp.ne.s32.totalorder %s4937_s30, %s3649_s8  ;;  %p3654_p4 = scmp.lt.s32.totalorder %s4937_s30, %s4984_s4 }
 0x83b   : > { %p3655_p8 = scmp.lt.s32.totalorder %s3653_s9, %s3649_s8 }
 0x83c   : > { %p3651_p5 = pnand %p3650_p13, %p5016_p10 }
 0x83d   : > { %p3656_p7 = por %p3655_p8, %p3654_p4 }
 0x83e   : > { %p3652_p0 = pneg %p3651_p5 }
 0x840   : > { %p3657_p11 = pnand %p3656_p7, %p3652_p0 }
 0x842   : > { %3660 = shalt.err (!%p3657_p11)
}
 0x843   : > { %s3717_s7 = smov 128   ;;  %s3718_s28 = smov 8  }
 0x844   : > { %3360 = dma.vmem_to_hbm [thread:$0]  (%p5016_p10), %s4932_s11, 1024, %s4937_s30, %s2640_s6, %s3717_s7, %s3717_s7, %s3718_s28  }
 0x845 PF: > { %s2668_s29 = sand.u32 1, %s3691_s15   ;;  %p5017_p1 = scmp.ne.s32.totalorder %s4990_s22, 0 }
 0x846   : > { %p5018_p2 = scmp.ge.s32.totalorder %s3703_s18, 2  ;;  %s2669_s26 = scalar_lea.sflag [#allocation6], %s2668_s29 }
 0x848   : > { %p3374_p6 = pnand %p5018_p2, %p5017_p1 }
 0x84a   : > { %p3375_p12 = pneg %p3374_p6 }
 0x84c   : > { %3686 = dma.done.wait (%p3375_p12), %s2669_s26, 1024  }
 0x84d   : > { %3688 = vsyncadd (%p3375_p12), %s2669_s26, 4294966272  ;;  %p18_p3 = scmp.ge.s32.totalorder %s3819_s13, 4   ;;  %s5019_s15 = smov %s3695_s16 }
 0x84e   : > { %s5020_s16 = smov %s3699_s17  ;;  %s5021_s17 = smov %s3828_s24 }
 0x84f   : > { %s5022_s18 = smov %s3819_s13  ;;  %20 = sbr.rel (!%p18_p3) target bundleno = 6 (0x6), region = 89 }
 0x854   :  { %2674 = vsyncpa [#allocation5], 1 }
 0x855   :  { %2676 = vsyncpa [#allocation5 + $0x1], 1 }
 0x856   :  { %2677 = vsyncpa [#allocation8], 1 }
 0x857   :  { %2678 = vsyncpa [#allocation6], 1 }
 0x858   :  { %2680 = vsyncpa [#allocation6 + $0x1], 1 }

</bundles_post_ra>
